<compile_context>
chip_gen: v7x
topology: tpu7x:2x2x1
jax: 0.10.0
libtpu: 0.0.40
codegen_flags: <defaults>
</compile_context>

<pallas_src>
import jax
import jax.numpy as jnp
from jax.experimental import pallas as pl
from jax.experimental.pallas import tpu as pltpu


def _rup(n, m=128):
    return ((n + m - 1) // m) * m


# ---------------------------------------------------------------------------
# Fused kernel: im2col-conv -> ReLU -> GAP -> fc1(+bn1) -> relu -> fc2(+bn2)
#               -> relu -> (dropout eval = id) -> fc3
# ---------------------------------------------------------------------------
def fused_kernel(p_ref,                 # (TILE_N, HW, Kp)   bf16 im2col patches
                 cw_ref, cb_ref,        # (Kp, Cp) bf16, (1, Cp) f32
                 w1_ref, b1_ref,        # (Cp, H1p) bf16, (1, H1p) f32  (BN folded)
                 w2_ref, b2_ref,        # (H1p, H2p) bf16, (1, H2p) f32 (BN folded)
                 w3_ref, b3_ref,        # (H2p, Ep) bf16, (1, Ep) f32
                 o_ref):                # (TILE_N, Ep) f32
    tn, hw, kp = p_ref.shape
    cp = cw_ref.shape[1]

    # Conv as ONE im2col matmul on the MXU (bf16 in, f32 acc).
    x = p_ref[...].reshape(tn * hw, kp)
    conv = jnp.dot(x, cw_ref[...], preferred_element_type=jnp.float32)
    conv = jnp.maximum(conv + cb_ref[...], 0.0)                     # bias + ReLU

    # Global average pool: sum over spatial then multiply by constant reciprocal.
    feat = conv.reshape(tn, hw, cp).sum(axis=1) * (1.0 / hw)        # (tn, Cp) f32

    # Head (BN folded into weights/biases).
    h = jnp.dot(feat.astype(jnp.bfloat16), w1_ref[...],
                preferred_element_type=jnp.float32) + b1_ref[...]
    h = jnp.maximum(h, 0.0)
    h = jnp.dot(h.astype(jnp.bfloat16), w2_ref[...],
                preferred_element_type=jnp.float32) + b2_ref[...]
    h = jnp.maximum(h, 0.0)
    # TODO(synk): training-mode dropout (p=0.3) omitted; eval mode => identity.
    o_ref[...] = jnp.dot(h.astype(jnp.bfloat16), w3_ref[...],
                         preferred_element_type=jnp.float32) + b3_ref[...]


# ---------------------------------------------------------------------------
# Wrapper: im2col + weight packing/folding/padding in XLA, one pallas_call.
# ---------------------------------------------------------------------------
def rescnn_encoder_forward(x_nchw, params, *, tile_n=8):
    """x_nchw: (N, Cin, H, W) float32  ->  (N, 1, embed) float32."""
    N, Cin, H, W = x_nchw.shape
    HW = H * W
    assert HW % 8 == 0, "spatial size must be a multiple of 8 for this kernel"

    Cfeat = params["conv_w"].shape[-1]
    H1 = params["w1"].shape[1]
    H2 = params["w2"].shape[1]
    E = params["w3"].shape[1]
    K = 9 * Cin

    Kp, Cp = _rup(K), _rup(Cfeat)
    H1p, H2p, Ep = _rup(H1), _rup(H2), _rup(E)
    Np = _rup(N, tile_n)

    # ---- im2col in the wrapper: lane-dense patch matrix (N, HW, 9*Cin) ----
    x_nhwc = jnp.transpose(x_nchw, (0, 2, 3, 1))
    x_pad = jnp.pad(x_nhwc, ((0, 0), (1, 1), (1, 1), (0, 0)))
    patches = jnp.concatenate(
        [x_pad[:, dy:dy + H, dx:dx + W, :] for dy in range(3) for dx in range(3)],
        axis=-1,
    ).reshape(N, HW, K)
    patches = jnp.pad(patches, ((0, Np - N), (0, 0), (0, Kp - K))).astype(jnp.bfloat16)

    # ---- pack/fold/pad weights once (bf16 for the MXU, f32 biases) ----
    cw = jnp.pad(params["conv_w"].reshape(K, Cfeat),
                 ((0, Kp - K), (0, Cp - Cfeat))).astype(jnp.bfloat16)
    cb = jnp.pad(params["conv_b"], ((0, 0), (0, Cp - Cfeat)))
    # BN eval folded into FC:  y = (x @ W + b) * s + t  ==  x @ (W*s) + (b*s + t)
    w1f = jnp.pad(params["w1"] * params["s1"],
                  ((0, Cp - Cfeat), (0, H1p - H1))).astype(jnp.bfloat16)
    b1f = jnp.pad(params["b1"] * params["s1"] + params["t1"], ((0, 0), (0, H1p - H1)))
    w2f = jnp.pad(params["w2"] * params["s2"],
                  ((0, H1p - H1), (0, H2p - H2))).astype(jnp.bfloat16)
    b2f = jnp.pad(params["b2"] * params["s2"] + params["t2"], ((0, 0), (0, H2p - H2)))
    w3p = jnp.pad(params["w3"], ((0, H2p - H2), (0, Ep - E))).astype(jnp.bfloat16)
    b3p = jnp.pad(params["b3"], ((0, 0), (0, Ep - E)))

    def resident(shape):
        return pl.BlockSpec(shape, lambda i: tuple(0 for _ in shape))

    out = pl.pallas_call(
        fused_kernel,
        out_shape=jax.ShapeDtypeStruct((Np, Ep), jnp.float32),
        grid=(Np // tile_n,),
        in_specs=[
            pl.BlockSpec((tile_n, HW, Kp), lambda i: (i, 0, 0)),   # patches: tiled over batch
            resident((Kp, Cp)), resident((1, Cp)),                 # conv weights stay resident
            resident((Cp, H1p)), resident((1, H1p)),
            resident((H1p, H2p)), resident((1, H2p)),
            resident((H2p, Ep)), resident((1, Ep)),
        ],
        out_specs=pl.BlockSpec((tile_n, Ep), lambda i: (i, 0)),
        compiler_params=pltpu.CompilerParams(
            dimension_semantics=("parallel",),          # megacore split on v7x
            vmem_limit_bytes=32 * 1024 * 1024,          # fits all of v5e/v6e/v7x budgets
        ),
    )(patches, cw, cb, w1f, b1f, w2f, b2f, w3p, b3p)

    return out[:N, :E][:, None, :]                      # unsqueeze(1): (N, 1, embed)


# ---------------------------------------------------------------------------
# Pure-JAX reference (same math, same bf16/f32 quantization) for correctness.
# ---------------------------------------------------------------------------
def reference_forward(x_nchw, p):
    N, Cin, H, W = x_nchw.shape
    x = jnp.transpose(x_nchw, (0, 2, 3, 1))
    xp = jnp.pad(x, ((0, 0), (1, 1), (1, 1), (0, 0)))
    patches = jnp.concatenate(
        [xp[:, dy:dy + H, dx:dx + W, :] for dy in range(3) for dx in range(3)],
        axis=-1,
    ).reshape(N * H * W, 9 * Cin)
    wc = p["conv_w"].reshape(9 * Cin, -1)
    conv = jnp.dot(patches.astype(jnp.bfloat16), wc.astype(jnp.bfloat16),
                   preferred_element_type=jnp.float32)
    conv = jnp.maximum(conv + p["conv_b"], 0.0)
    feat = conv.reshape(N, H * W, -1).sum(axis=1) * (1.0 / (H * W))

    w1f = (p["w1"] * p["s1"]).astype(jnp.bfloat16)
    b1f = p["b1"] * p["s1"] + p["t1"]
    w2f = (p["w2"] * p["s2"]).astype(jnp.bfloat16)
    b2f = p["b2"] * p["s2"] + p["t2"]

    h = jnp.maximum(jnp.dot(feat.astype(jnp.bfloat16), w1f,
                            preferred_element_type=jnp.float32) + b1f, 0.0)
    h = jnp.maximum(jnp.dot(h.astype(jnp.bfloat16), w2f,
                            preferred_element_type=jnp.float32) + b2f, 0.0)
    out = jnp.dot(h.astype(jnp.bfloat16), p["w3"].astype(jnp.bfloat16),
                  preferred_element_type=jnp.float32) + p["b3"]
    return out[:, None, :]


# ---------------------------------------------------------------------------
def make_params(key, cin=4, cfeat=64, h1=32, h2=32, embed=16):
    ks = jax.random.split(key, 12)
    eps = 1e-5

    def lin(k, fan_in, shape):
        return (jax.random.normal(k, shape, jnp.float32) / jnp.sqrt(fan_in)).astype(jnp.float32)

    # BN (eval mode) folded affine: s = gamma / sqrt(var + eps), t = beta - mean * s
    def bn_affine(kg, kb, dim):
        gamma = 1.0 + 0.1 * jax.random.normal(kg, (dim,), jnp.float32)
        beta = 0.1 * jax.random.normal(kb, (dim,), jnp.float32)
        mean = jnp.zeros((dim,), jnp.float32)
        var = jnp.ones((dim,), jnp.float32)
        s = gamma / jnp.sqrt(var + eps)
        t = beta - mean * s
        return s[None, :], t[None, :]

    s1, t1 = bn_affine(ks[6], ks[7], h1)
    s2, t2 = bn_affine(ks[8], ks[9], h2)

    return {
        "conv_w": lin(ks[0], cin * 9, (3, 3, cin, cfeat)),
        "conv_b": 0.05 * jax.random.normal(ks[1], (1, cfeat), jnp.float32),
        "w1": lin(ks[2], cfeat, (cfeat, h1)),
        "b1": 0.05 * jax.random.normal(ks[3], (1, h1), jnp.float32),
        "s1": s1, "t1": t1,
        "w2": lin(ks[4], h1, (h1, h2)),
        "b2": 0.05 * jax.random.normal(ks[5], (1, h2), jnp.float32),
        "s2": s2, "t2": t2,
        "w3": lin(ks[10], h2, (h2, embed)),
        "b3": 0.05 * jax.random.normal(ks[11], (1, embed), jnp.float32),
    }


if __name__ == "__main__":
    key = jax.random.PRNGKey(0)
    kx, kp = jax.random.split(key)

    N, Cin, H, W = 2, 4, 16, 16
    x = jax.random.normal(kx, (N, Cin, H, W), jnp.float32)
    params = make_params(kp, cin=Cin, cfeat=64, h1=32, h2=32, embed=16)

    out = rescnn_encoder_forward(x, params)
    out = jax.block_until_ready(out)
    assert out.shape == (N, 1, 16), out.shape

    ref = reference_forward(x, params)
    err = float(jnp.max(jnp.abs(out - ref)))
    assert jnp.allclose(out, ref, rtol=2e-3, atol=2e-3), err

    print("KERNEL_OK")
</pallas_src>

<mosaic_0001>
module attributes {stable_mosaic.version = 11 : i64} {
  func.func @fused_kernel(%arg0: i32, %arg1: memref<8x256x128xbf16, #tpu.memory_space<vmem>>, %arg2: memref<128x128xbf16, #tpu.memory_space<vmem>>, %arg3: memref<1x128xf32, #tpu.memory_space<vmem>>, %arg4: memref<128x128xbf16, #tpu.memory_space<vmem>>, %arg5: memref<1x128xf32, #tpu.memory_space<vmem>>, %arg6: memref<128x128xbf16, #tpu.memory_space<vmem>>, %arg7: memref<1x128xf32, #tpu.memory_space<vmem>>, %arg8: memref<128x128xbf16, #tpu.memory_space<vmem>>, %arg9: memref<1x128xf32, #tpu.memory_space<vmem>>, %arg10: memref<8x128xf32, #tpu.memory_space<vmem>>) attributes {dimension_semantics = [#tpu.dimension_semantics<parallel>], iteration_bounds = array<i64: 1>, scalar_prefetch = 0 : i64, scratch_operands = 0 : i64, tpu.core_type = #tpu.core_type<tc>, window_params = [{transform_indices = @transform_0, window_bounds = array<i64: 8, 256, 128>}, {pipeline_mode = #tpu.pipeline_mode<synchronous>, transform_indices = @transform_1, window_bounds = array<i64: 128, 128>}, {pipeline_mode = #tpu.pipeline_mode<synchronous>, transform_indices = @transform_2, window_bounds = array<i64: 1, 128>}, {pipeline_mode = #tpu.pipeline_mode<synchronous>, transform_indices = @transform_3, window_bounds = array<i64: 128, 128>}, {pipeline_mode = #tpu.pipeline_mode<synchronous>, transform_indices = @transform_4, window_bounds = array<i64: 1, 128>}, {pipeline_mode = #tpu.pipeline_mode<synchronous>, transform_indices = @transform_5, window_bounds = array<i64: 128, 128>}, {pipeline_mode = #tpu.pipeline_mode<synchronous>, transform_indices = @transform_6, window_bounds = array<i64: 1, 128>}, {pipeline_mode = #tpu.pipeline_mode<synchronous>, transform_indices = @transform_7, window_bounds = array<i64: 128, 128>}, {pipeline_mode = #tpu.pipeline_mode<synchronous>, transform_indices = @transform_8, window_bounds = array<i64: 1, 128>}, {transform_indices = @transform_9, window_bounds = array<i64: 8, 128>}]} {
    %c0 = arith.constant 0 : index
    %c0_0 = arith.constant 0 : index
    %c0_1 = arith.constant 0 : index
    %0 = vector.load %arg1[%c0, %c0_0, %c0_1] : memref<8x256x128xbf16, #tpu.memory_space<vmem>>, vector<8x256x128xbf16>
    %1 = vector.shape_cast %0 : vector<8x256x128xbf16> to vector<2048x128xbf16>
    %c0_2 = arith.constant 0 : index
    %c0_3 = arith.constant 0 : index
    %2 = vector.load %arg2[%c0_2, %c0_3] : memref<128x128xbf16, #tpu.memory_space<vmem>>, vector<128x128xbf16>
    %cst = arith.constant dense<0.000000e+00> : vector<2048x128xf32>
    %3 = tpu.matmul %1, %2, %cst {dimension_numbers = #tpu.dot_dimension_numbers<[1], [0], [0], [1], [0, 0, 1, 1], [], []>} : vector<2048x128xbf16>, vector<128x128xbf16>, vector<2048x128xf32> -> vector<2048x128xf32>
    %c0_4 = arith.constant 0 : index
    %c0_5 = arith.constant 0 : index
    %4 = vector.load %arg3[%c0_4, %c0_5] : memref<1x128xf32, #tpu.memory_space<vmem>>, vector<1x128xf32>
    %5 = vector.broadcast %4 : vector<1x128xf32> to vector<2048x128xf32>
    %6 = arith.addf %3, %5 : vector<2048x128xf32>
    %cst_6 = arith.constant 0.000000e+00 : f32
    %7 = vector.broadcast %cst_6 : f32 to vector<2048x128xf32>
    %8 = arith.maximumf %6, %7 : vector<2048x128xf32>
    %9 = vector.shape_cast %8 : vector<2048x128xf32> to vector<8x256x128xf32>
    %cst_7 = arith.constant dense<0.000000e+00> : vector<8x128xf32>
    %10 = vector.multi_reduction <add>, %9, %cst_7 [1] : vector<8x256x128xf32> to vector<8x128xf32>
    %cst_8 = arith.constant 3.906250e-03 : f32
    %11 = vector.broadcast %cst_8 : f32 to vector<8x128xf32>
    %12 = arith.mulf %10, %11 : vector<8x128xf32>
    %13 = arith.truncf %12 : vector<8x128xf32> to vector<8x128xbf16>
    %c0_9 = arith.constant 0 : index
    %c0_10 = arith.constant 0 : index
    %14 = vector.load %arg4[%c0_9, %c0_10] : memref<128x128xbf16, #tpu.memory_space<vmem>>, vector<128x128xbf16>
    %cst_11 = arith.constant dense<0.000000e+00> : vector<8x128xf32>
    %15 = tpu.matmul %13, %14, %cst_11 {dimension_numbers = #tpu.dot_dimension_numbers<[1], [0], [0], [1], [0, 0, 1, 1], [], []>} : vector<8x128xbf16>, vector<128x128xbf16>, vector<8x128xf32> -> vector<8x128xf32>
    %c0_12 = arith.constant 0 : index
    %c0_13 = arith.constant 0 : index
    %16 = vector.load %arg5[%c0_12, %c0_13] : memref<1x128xf32, #tpu.memory_space<vmem>>, vector<1x128xf32>
    %17 = vector.broadcast %16 : vector<1x128xf32> to vector<8x128xf32>
    %18 = arith.addf %15, %17 : vector<8x128xf32>
    %cst_14 = arith.constant 0.000000e+00 : f32
    %19 = vector.broadcast %cst_14 : f32 to vector<8x128xf32>
    %20 = arith.maximumf %18, %19 : vector<8x128xf32>
    %21 = arith.truncf %20 : vector<8x128xf32> to vector<8x128xbf16>
    %c0_15 = arith.constant 0 : index
    %c0_16 = arith.constant 0 : index
    %22 = vector.load %arg6[%c0_15, %c0_16] : memref<128x128xbf16, #tpu.memory_space<vmem>>, vector<128x128xbf16>
    %cst_17 = arith.constant dense<0.000000e+00> : vector<8x128xf32>
    %23 = tpu.matmul %21, %22, %cst_17 {dimension_numbers = #tpu.dot_dimension_numbers<[1], [0], [0], [1], [0, 0, 1, 1], [], []>} : vector<8x128xbf16>, vector<128x128xbf16>, vector<8x128xf32> -> vector<8x128xf32>
    %c0_18 = arith.constant 0 : index
    %c0_19 = arith.constant 0 : index
    %24 = vector.load %arg7[%c0_18, %c0_19] : memref<1x128xf32, #tpu.memory_space<vmem>>, vector<1x128xf32>
    %25 = vector.broadcast %24 : vector<1x128xf32> to vector<8x128xf32>
    %26 = arith.addf %23, %25 : vector<8x128xf32>
    %cst_20 = arith.constant 0.000000e+00 : f32
    %27 = vector.broadcast %cst_20 : f32 to vector<8x128xf32>
    %28 = arith.maximumf %26, %27 : vector<8x128xf32>
    %29 = arith.truncf %28 : vector<8x128xf32> to vector<8x128xbf16>
    %c0_21 = arith.constant 0 : index
    %c0_22 = arith.constant 0 : index
    %30 = vector.load %arg8[%c0_21, %c0_22] : memref<128x128xbf16, #tpu.memory_space<vmem>>, vector<128x128xbf16>
    %cst_23 = arith.constant dense<0.000000e+00> : vector<8x128xf32>
    %31 = tpu.matmul %29, %30, %cst_23 {dimension_numbers = #tpu.dot_dimension_numbers<[1], [0], [0], [1], [0, 0, 1, 1], [], []>} : vector<8x128xbf16>, vector<128x128xbf16>, vector<8x128xf32> -> vector<8x128xf32>
    %c0_24 = arith.constant 0 : index
    %c0_25 = arith.constant 0 : index
    %32 = vector.load %arg9[%c0_24, %c0_25] : memref<1x128xf32, #tpu.memory_space<vmem>>, vector<1x128xf32>
    %33 = vector.broadcast %32 : vector<1x128xf32> to vector<8x128xf32>
    %34 = arith.addf %31, %33 : vector<8x128xf32>
    %c0_26 = arith.constant 0 : index
    %c0_27 = arith.constant 0 : index
    %35 = vector.load %arg10[%c0_26, %c0_27] : memref<8x128xf32, #tpu.memory_space<vmem>>, vector<8x128xf32>
    tpu.vector_store %arg10[%c0_26, %c0_27], %34 {strides = array<i32>} : memref<8x128xf32, #tpu.memory_space<vmem>>, vector<8x128xf32>,
    return
  }
  func.func @transform_0(%arg0: i32) -> (i32, i32, i32) {
    %c0_i32 = arith.constant 0 : i32
    %c0_i32_0 = arith.constant 0 : i32
    %c0_i32_1 = arith.constant 0 : i32
    return %arg0, %c0_i32, %c0_i32_0 : i32, i32, i32
  }
  func.func @transform_1(%arg0: i32) -> (i32, i32) {
    %c0_i32 = arith.constant 0 : i32
    %c0_i32_0 = arith.constant 0 : i32
    %c0_i32_1 = arith.constant 0 : i32
    return %c0_i32, %c0_i32_0 : i32, i32
  }
  func.func @transform_2(%arg0: i32) -> (i32, i32) {
    %c0_i32 = arith.constant 0 : i32
    %c0_i32_0 = arith.constant 0 : i32
    %c0_i32_1 = arith.constant 0 : i32
    return %c0_i32, %c0_i32_0 : i32, i32
  }
  func.func @transform_3(%arg0: i32) -> (i32, i32) {
    %c0_i32 = arith.constant 0 : i32
    %c0_i32_0 = arith.constant 0 : i32
    %c0_i32_1 = arith.constant 0 : i32
    return %c0_i32, %c0_i32_0 : i32, i32
  }
  func.func @transform_4(%arg0: i32) -> (i32, i32) {
    %c0_i32 = arith.constant 0 : i32
    %c0_i32_0 = arith.constant 0 : i32
    %c0_i32_1 = arith.constant 0 : i32
    return %c0_i32, %c0_i32_0 : i32, i32
  }
  func.func @transform_5(%arg0: i32) -> (i32, i32) {
    %c0_i32 = arith.constant 0 : i32
    %c0_i32_0 = arith.constant 0 : i32
    %c0_i32_1 = arith.constant 0 : i32
    return %c0_i32, %c0_i32_0 : i32, i32
  }
  func.func @transform_6(%arg0: i32) -> (i32, i32) {
    %c0_i32 = arith.constant 0 : i32
    %c0_i32_0 = arith.constant 0 : i32
    %c0_i32_1 = arith.constant 0 : i32
    return %c0_i32, %c0_i32_0 : i32, i32
  }
  func.func @transform_7(%arg0: i32) -> (i32, i32) {
    %c0_i32 = arith.constant 0 : i32
    %c0_i32_0 = arith.constant 0 : i32
    %c0_i32_1 = arith.constant 0 : i32
    return %c0_i32, %c0_i32_0 : i32, i32
  }
  func.func @transform_8(%arg0: i32) -> (i32, i32) {
    %c0_i32 = arith.constant 0 : i32
    %c0_i32_0 = arith.constant 0 : i32
    %c0_i32_1 = arith.constant 0 : i32
    return %c0_i32, %c0_i32_0 : i32, i32
  }
  func.func @transform_9(%arg0: i32) -> (i32, i32) {
    %c0_i32 = arith.constant 0 : i32
    %c0_i32_0 = arith.constant 0 : i32
    return %arg0, %c0_i32 : i32, i32
  }
}

</mosaic_0001>

<bundles_post_ra>
// kernel: tpu_custom_call.1
= control target key start
LH: loop header
LB: loop body
LE: loop exit
PB: predicated region body
PF: predicated region fallthrough
CT: control target
= control target key end

     0   :  { %14 = vsyncpa [#allocation3], 0  ;;  %s4729_s0 = inlined_call_operand.hbm [shape: bf16[8,256,128], index: 0, kind: input, shape index: {}]   ;;  %s4730_s1 = inlined_call_operand.hbm [shape: bf16[128,128], index: 1, kind: input, shape index: {}]   ;;  %s4731_s2 = inlined_call_operand.vmem [shape: f32[1,128], index: 2, kind: input, shape index: {}]   ;;  %s4732_s3 = inlined_call_operand.hbm [shape: bf16[128,128], index: 3, kind: input, shape index: {}]   ;;  %s4733_s4 = inlined_call_operand.vmem [shape: f32[1,128], index: 4, kind: input, shape index: {}]   ;;  %s4734_s5 = inlined_call_operand.hbm [shape: bf16[128,128], index: 5, kind: input, shape index: {}]   ;;  %s4735_s6 = inlined_call_operand.vmem [shape: f32[1,128], index: 6, kind: input, shape index: {}]   ;;  %s4736_s7 = inlined_call_operand.hbm [shape: bf16[128,128], index: 7, kind: input, shape index: {}]   ;;  %s4737_s8 = inlined_call_operand.vmem [shape: f32[1,128], index: 8, kind: input, shape index: {}]   ;;  %s4738_s9 = inlined_call_operand.hbm [shape: f32[8,128], index: 9, kind: output, shape index: {}]  }
   0x1   :  { %15 = vsyncpa [#allocation6], 0 }
   0x2   :  { %16 = vsyncpa [#allocation9], 0 }
   0x3   :  { %17 = vsyncpa [#allocation4], 0  ;;  %s4196_s30 = smov [#allocation5]   ;;  %s4197_s11 = smov [#allocation8]  }
   0x4   :  { %s35_s10 = sshll.u32 %s4196_s30, 4  ;;  %s63_s12 = sshll.u32 %s4197_s11, 4  ;;  %s36_s10 = int_to_ptr.vmem [resolvable:$true] %s35_s10  ;;  %s4256_s12 = int_to_ptr.vmem [resolvable:$true] %s63_s12 }
   0x5   :  { %s4056_s15 = scalar_lea.hbm %s4730_s1, 1024 }
   0x6   :  { %p4057_p0 = scmp.ne.s32.totalorder %s4730_s1, %s4056_s15  ;;  %p4060_p1 = scmp.lt.u32.totalorder %s4056_s15, %s4730_s1 }
   0x8   :  { %p4062_p2 = pnand %p4060_p1, %p4057_p0 }
   0xa   :  { %4065 = shalt.err (!%p4062_p2)
}
   0xb   :  { %s4066_s20 = scalar_lea.vmem %s36_s10, 1024  ;;  %p4071_p4 = scmp.lt.s32.totalorder %s36_s10, %s36_s10 }
   0xc   :  { %p4067_p3 = scmp.ne.s32.totalorder %s36_s10, %s4066_s20  ;;  %p4072_p5 = scmp.lt.s32.totalorder %s4066_s20, %s4066_s20 }
   0xe   :  { %p4073_p6 = por %p4072_p5, %p4071_p4 }
  0x10   :  { %p4074_p7 = pnand %p4073_p6, %p4067_p3 }
  0x12   :  { %4077 = shalt.err (!%p4074_p7)
}
  0x13   :  { %s4198_s21 = smov 64   ;;  %s4199_s22 = smov 4  }
  0x14   :  { %41 = dma.hbm_to_vmem [thread:$0]  %s4730_s1, 1024, %s36_s10, [#allocation6], %s4198_s21, %s4198_s21, %s4199_s22  }
  0x15   :  { %s4078_s27 = scalar_lea.hbm %s4734_s5, 1024 }
  0x16   :  { %p4079_p8 = scmp.ne.s32.totalorder %s4734_s5, %s4078_s27  ;;  %p4082_p9 = scmp.lt.u32.totalorder %s4078_s27, %s4734_s5 }
  0x18   :  { %p4084_p10 = pnand %p4082_p9, %p4079_p8 }
  0x1a   :  { %4087 = shalt.err (!%p4084_p10)
}
  0x1b   :  { %s4088_s13 = scalar_lea.vmem %s4256_s12, 1024  ;;  %p4093_p12 = scmp.lt.s32.totalorder %s4256_s12, %s4256_s12 }
  0x1c   :  { %p4089_p11 = scmp.ne.s32.totalorder %s4256_s12, %s4088_s13  ;;  %p4094_p13 = scmp.lt.s32.totalorder %s4088_s13, %s4088_s13 }
  0x1e   :  { %p4095_p0 = por %p4094_p13, %p4093_p12 }
  0x20   :  { %p4096_p1 = pnand %p4095_p0, %p4089_p11 }
  0x22   :  { %4099 = shalt.err (!%p4096_p1)
}
  0x23   :  { %69 = dma.hbm_to_vmem [thread:$0]  %s4734_s5, 1024, %s4256_s12, [#allocation9], %s4198_s21, %s4198_s21, %s4199_s22  }
  0x24   :  { %s4200_s14 = smov [#allocation2]   ;;  %s4201_s16 = smov [#allocation7]  }
  0x25   :  { %s23_s15 = sshll.u32 %s4200_s14, 4  ;;  %s49_s17 = sshll.u32 %s4201_s16, 4  ;;  %s24_s15 = int_to_ptr.vmem [resolvable:$true] %s23_s15  ;;  %s4293_s17 = int_to_ptr.vmem [resolvable:$true] %s49_s17 }
  0x26   :  { %s4100_s20 = scalar_lea.hbm %s4729_s0, 16384 }
  0x27   :  { %p4101_p2 = scmp.ne.s32.totalorder %s4729_s0, %s4100_s20  ;;  %p4104_p3 = scmp.lt.u32.totalorder %s4100_s20, %s4729_s0 }
  0x29   :  { %p4106_p4 = pnand %p4104_p3, %p4101_p2 }
  0x2b   :  { %4109 = shalt.err (!%p4106_p4)
}
  0x2c   :  { %s4110_s5 = scalar_lea.vmem %s24_s15, 16384  ;;  %p4115_p6 = scmp.lt.s32.totalorder %s24_s15, %s24_s15 }
  0x2d   :  { %p4111_p5 = scmp.ne.s32.totalorder %s24_s15, %s4110_s5  ;;  %p4116_p7 = scmp.lt.s32.totalorder %s4110_s5, %s4110_s5 }
  0x2f   :  { %p4117_p8 = por %p4116_p7, %p4115_p6 }
  0x31   :  { %p4118_p9 = pnand %p4117_p8, %p4111_p5 }
  0x33   :  { %4121 = shalt.err (!%p4118_p9)
}
  0x34   :  { %29 = dma.hbm_to_vmem [thread:$0]  %s4729_s0, 16384, %s24_s15, [#allocation3], %s4198_s21, %s4198_s21, %s4199_s22  }
  0x35   :  { %s4122_s30 = scalar_lea.hbm %s4732_s3, 1024 }
  0x36   :  { %p4123_p10 = scmp.ne.s32.totalorder %s4732_s3, %s4122_s30  ;;  %p4126_p11 = scmp.lt.u32.totalorder %s4122_s30, %s4732_s3 }
  0x38   :  { %p4128_p12 = pnand %p4126_p11, %p4123_p10 }
  0x3a   :  { %4131 = shalt.err (!%p4128_p12)
}
  0x3b   :  { %s4132_s14 = scalar_lea.vmem %s4293_s17, 1024  ;;  %p4137_p0 = scmp.lt.s32.totalorder %s4293_s17, %s4293_s17 }
  0x3c   :  { %p4133_p13 = scmp.ne.s32.totalorder %s4293_s17, %s4132_s14  ;;  %p4138_p1 = scmp.lt.s32.totalorder %s4132_s14, %s4132_s14 }
  0x3e   :  { %p4139_p2 = por %p4138_p1, %p4137_p0 }
  0x40   :  { %p4140_p3 = pnand %p4139_p2, %p4133_p13 }
  0x42   :  { %4143 = shalt.err (!%p4140_p3)
}
  0x43   :  { %55 = dma.hbm_to_vmem [thread:$0]  %s4732_s3, 1024, %s4293_s17, [#allocation6], %s4198_s21, %s4198_s21, %s4199_s22  }
  0x44   :  { %s4202_s16 = smov [#allocation10]   ;;  %s4144_s23 = scalar_lea.hbm %s4736_s7, 1024 }
  0x45   :  { %s77_s18 = sshll.u32 %s4202_s16, 4  ;;  %p4145_p4 = scmp.ne.s32.totalorder %s4736_s7, %s4144_s23  ;;  %s78_s18 = int_to_ptr.vmem [resolvable:$true] %s77_s18 }
  0x46   :  { %p4148_p5 = scmp.lt.u32.totalorder %s4144_s23, %s4736_s7 }
  0x48   :  { %p4150_p6 = pnand %p4148_p5, %p4145_p4 }
  0x4a   :  { %4153 = shalt.err (!%p4150_p6)
}
  0x4b   :  { %s4154_s12 = scalar_lea.vmem %s78_s18, 1024  ;;  %p4159_p8 = scmp.lt.s32.totalorder %s78_s18, %s78_s18 }
  0x4c   :  { %p4155_p7 = scmp.ne.s32.totalorder %s78_s18, %s4154_s12  ;;  %p4160_p9 = scmp.lt.s32.totalorder %s4154_s12, %s4154_s12 }
  0x4e   :  { %p4161_p10 = por %p4160_p9, %p4159_p8 }
  0x50   :  { %p4162_p11 = pnand %p4161_p10, %p4155_p7 }
  0x52   :  { %4165 = shalt.err (!%p4162_p11)
}
  0x53   :  { %83 = dma.hbm_to_vmem [thread:$0]  %s4736_s7, 1024, %s78_s18, [#allocation9], %s4198_s21, %s4198_s21, %s4199_s22  }
  0x54   :  { %4188 = dma.done.wait [#allocation3], 16384  }
  0x55   :  { %4189 = vsyncadd [#allocation3], 4294950912 }
  0x56   :  { %4190 = dma.done.wait [#allocation6], 2048  }
  0x57   :  { %4191 = vsyncadd [#allocation6], 4294965248 }
  0x58   :  { %4192 = dma.done.wait [#allocation9], 2048  }
  0x59   :  { %4193 = vsyncadd [#allocation9], 4294965248  ;;  %v3894_v0 = vld [vmem:[#allocation5] sm:$0xff]   ;;  %v3895_v1 = vld [vmem:[#allocation5 + $0x8] sm:$0xff]   ;;  %vm2861_vm0 = vcmask 1041409   ;;  %vm4204_vm1 = vmmov 0  }
  0x5a   :  { %3536 = vmatprep.subr.bf16.mxu0 %v3894_v0  ;;  %3868 = vmatprep.subr.bf16.mxu1 %v3894_v0  ;;  %v3896_v2 = vld [vmem:[#allocation5 + $0x10] sm:$0xff]   ;;  %v3897_v3 = vld [vmem:[#allocation5 + $0x18] sm:$0xff]   ;;  %v3902_v4 = vld [vmem:[#allocation2] sm:$0xff]   ;;  %vm2863_vm2 = vcmask 1042434   ;;  %vm2865_vm3 = vcmask 1043459   ;;  %vm2867_vm4 = vcmask 1044484  }
  0x5b   :  { %3537 = vmatpush3.bf16.msra.mxu0 %v3894_v0  ;;  %3876 = vmatpush3.bf16.msra.mxu1 %v3894_v0  ;;  %v3898_v5 = vld [vmem:[#allocation5 + $0x20] sm:$0xff]   ;;  %v3899_v6 = vld [vmem:[#allocation5 + $0x28] sm:$0xff]   ;;  %v3900_v7 = vld [vmem:[#allocation5 + $0x30] sm:$0xff]   ;;  %vm2869_vm5 = vcmask 1045509   ;;  %vm2871_vm6 = vcmask 1046534   ;;  %vm2873_vm7 = vcmask 1047559  }
  0x5c   :  { %3538 = vmatprep.subr.bf16.mxu0 %v3895_v1  ;;  %3869 = vmatprep.subr.bf16.mxu1 %v3895_v1  ;;  %v3901_v8 = vld [vmem:[#allocation5 + $0x38] sm:$0xff]   ;;  %v3903_v9 = vld [vmem:[#allocation2 + $0x8] sm:$0xff]   ;;  %v3904_v10 = vld [vmem:[#allocation2 + $0x10] sm:$0xff]   ;;  %s4205_s10 = smov [#allocation11]  }
  0x5d   :  { %3552 = vmatprep.mubr.bf16.mxu0 %v3902_v4  ;;  %v3926_v11 = vld [vmem:[#allocation2 + $0x250] sm:$0xff]   ;;  %v3927_v12 = vld [vmem:[#allocation2 + $0x258] sm:$0xff]   ;;  %v3930_v13 = vld [vmem:[#allocation2 + $0x260] sm:$0xff]   ;;  %s3198_s14 = sshll.u32 %s4205_s10, 4  ;;  %s3199_s14 = int_to_ptr.vmem [resolvable:$true] %s3198_s14 }
  0x5e   :  { %3700 = vmatprep.mubr.bf16.mxu1 %v3926_v11  ;;  %v3905_v14 = vld [vmem:[#allocation2 + $0x18] sm:$0xff]   ;;  %v3906_v15 = vld [vmem:[#allocation2 + $0x20] sm:$0xff]   ;;  %v3931_v16 = vld [vmem:[#allocation2 + $0x268] sm:$0xff]   ;;  %p4171_p13 = scmp.lt.s32.totalorder %s3199_s14, %s3199_s14 }
  0x5f   :  { %3539 = vmatpush3.bf16.msra.mxu0 %v3895_v1  ;;  %3877 = vmatpush3.bf16.msra.mxu1 %v3895_v1  ;;  %v3934_v17 = vld [vmem:[#allocation2 + $0x270] sm:$0xff]   ;;  %v3907_v18 = vld [vmem:[#allocation2 + $0x28] sm:$0xff]   ;;  %v3935_v20 = vld [vmem:[#allocation2 + $0x278] sm:$0xff]  }
  0x60   :  { %3540 = vmatprep.subr.bf16.mxu0 %v3896_v2  ;;  %3870 = vmatprep.subr.bf16.mxu1 %v3896_v2  ;;  %v3908_v19 = vld [vmem:[#allocation2 + $0x30] sm:$0xff]   ;;  %v3938_v21 = vld [vmem:[#allocation2 + $0x280] sm:$0xff]   ;;  %v3909_v22 = vld [vmem:[#allocation2 + $0x38] sm:$0xff]  }
  0x61   :  { %v3910_v23 = vld [vmem:[#allocation2 + $0x40] sm:$0xff]   ;;  %v3939_v24 = vld [vmem:[#allocation2 + $0x288] sm:$0xff]   ;;  %v3942_v25 = vld [vmem:[#allocation2 + $0x290] sm:$0xff]  }
  0x62   :  { %v3911_v26 = vld [vmem:[#allocation2 + $0x48] sm:$0xff]   ;;  %v3912_v27 = vld [vmem:[#allocation2 + $0x50] sm:$0xff]   ;;  %v3943_v28 = vld [vmem:[#allocation2 + $0x298] sm:$0xff]  }
  0x63   :  { %3541 = vmatpush3.bf16.msra.mxu0 %v3896_v2  ;;  %3878 = vmatpush3.bf16.msra.mxu1 %v3896_v2  ;;  %v3946_v29 = vld [vmem:[#allocation2 + $0x2a0] sm:$0xff]   ;;  %v3913_v30 = vld [vmem:[#allocation2 + $0x58] sm:$0xff]   ;;  %v3947_v32 = vld [vmem:[#allocation2 + $0x2a8] sm:$0xff]  }
  0x64   :  { %3542 = vmatprep.subr.bf16.mxu0 %v3897_v3  ;;  %3871 = vmatprep.subr.bf16.mxu1 %v3897_v3  ;;  %v3914_v31 = vld [vmem:[#allocation2 + $0x60] sm:$0xff]   ;;  %v3950_v33 = vld [vmem:[#allocation2 + $0x2b0] sm:$0xff]   ;;  %v3915_v34 = vld [vmem:[#allocation2 + $0x68] sm:$0xff]  }
  0x65   :  { %v3916_v35 = vld [vmem:[#allocation2 + $0x70] sm:$0xff]   ;;  %v3951_v36 = vld [vmem:[#allocation2 + $0x2b8] sm:$0xff]   ;;  %v3954_v37 = vld [vmem:[#allocation2 + $0x2c0] sm:$0xff]  }
  0x66   :  { %v3917_v38 = vld [vmem:[#allocation2 + $0x78] sm:$0xff]   ;;  %v3918_v39 = vld [vmem:[#allocation2 + $0x80] sm:$0xff]   ;;  %v3955_v40 = vld [vmem:[#allocation2 + $0x2c8] sm:$0xff]  }
  0x67   :  { %3543 = vmatpush3.bf16.msra.mxu0 %v3897_v3  ;;  %3879 = vmatpush3.bf16.msra.mxu1 %v3897_v3  ;;  %v3958_v41 = vld [vmem:[#allocation2 + $0x2d0] sm:$0xff]   ;;  %v3919_v42 = vld [vmem:[#allocation2 + $0x88] sm:$0xff]   ;;  %v3959_v44 = vld [vmem:[#allocation2 + $0x2d8] sm:$0xff]  }
  0x68   :  { %3544 = vmatprep.subr.bf16.mxu0 %v3898_v5  ;;  %3872 = vmatprep.subr.bf16.mxu1 %v3898_v5  ;;  %v3920_v43 = vld [vmem:[#allocation2 + $0x90] sm:$0xff]   ;;  %v3962_v45 = vld [vmem:[#allocation2 + $0x2e0] sm:$0xff]   ;;  %v3921_v46 = vld [vmem:[#allocation2 + $0x98] sm:$0xff]  }
  0x69   :  { %v3922_v47 = vld [vmem:[#allocation2 + $0xa0] sm:$0xff]   ;;  %v3963_v48 = vld [vmem:[#allocation2 + $0x2e8] sm:$0xff]   ;;  %v3966_v49 = vld [vmem:[#allocation2 + $0x2f0] sm:$0xff]  }
  0x6a   :  { %v3923_v50 = vld [vmem:[#allocation2 + $0xa8] sm:$0xff]   ;;  %v3924_v51 = vld [vmem:[#allocation2 + $0xb0] sm:$0xff]   ;;  %v3967_v52 = vld [vmem:[#allocation2 + $0x2f8] sm:$0xff]  }
  0x6b   :  { %3545 = vmatpush3.bf16.msra.mxu0 %v3898_v5  ;;  %3880 = vmatpush3.bf16.msra.mxu1 %v3898_v5  ;;  %v3970_v53 = vld [vmem:[#allocation2 + $0x300] sm:$0xff]   ;;  %v3925_v54 = vld [vmem:[#allocation2 + $0xb8] sm:$0xff]   ;;  %v3971_v56 = vld [vmem:[#allocation2 + $0x308] sm:$0xff]  }
  0x6c   :  { %3546 = vmatprep.subr.bf16.mxu0 %v3899_v6  ;;  %3873 = vmatprep.subr.bf16.mxu1 %v3899_v6  ;;  %v3928_v55 = vld [vmem:[#allocation2 + $0xc0] sm:$0xff]   ;;  %v3974_v57 = vld [vmem:[#allocation2 + $0x310] sm:$0xff]   ;;  %v3929_v58 = vld [vmem:[#allocation2 + $0xc8] sm:$0xff]  }
  0x6d   :  { %v3932_v59 = vld [vmem:[#allocation2 + $0xd0] sm:$0xff]   ;;  %v3975_v60 = vld [vmem:[#allocation2 + $0x318] sm:$0xff]   ;;  %v3978_v61 = vld [vmem:[#allocation2 + $0x320] sm:$0xff]  }
  0x6e   :  { %v3933_v62 = vld [vmem:[#allocation2 + $0xd8] sm:$0xff]   ;;  %v3936_v63 = vld [vmem:[#allocation2 + $0xe0] sm:$0xff]   ;;  %v3979_v0 = vld [vmem:[#allocation2 + $0x328] sm:$0xff]  }
  0x6f   :  { %3547 = vmatpush3.bf16.msra.mxu0 %v3899_v6  ;;  %3881 = vmatpush3.bf16.msra.mxu1 %v3899_v6  ;;  %v3982_v1 = vld [vmem:[#allocation2 + $0x330] sm:$0xff]   ;;  %v3937_v2 = vld [vmem:[#allocation2 + $0xe8] sm:$0xff]   ;;  %v3983_v4 = vld [vmem:[#allocation2 + $0x338] sm:$0xff]  }
  0x70   :  { %3548 = vmatprep.subr.bf16.mxu0 %v3900_v7  ;;  %3874 = vmatprep.subr.bf16.mxu1 %v3900_v7  ;;  %v3940_v3 = vld [vmem:[#allocation2 + $0xf0] sm:$0xff]   ;;  %v3986_v5 = vld [vmem:[#allocation2 + $0x340] sm:$0xff]   ;;  %v3941_v6 = vld [vmem:[#allocation2 + $0xf8] sm:$0xff]  }
  0x71   :  { %v3948_v11 = vld [vmem:[#allocation2 + $0x110] sm:$0xff]  }
  0x73   :  { %3549 = vmatpush3.bf16.msra.mxu0 %v3900_v7  ;;  %3882 = vmatpush3.bf16.msra.mxu1 %v3900_v7  ;;  %v3944_v7 = vld [vmem:[#allocation2 + $0x100] sm:$0xff]  }
  0x74   :  { %3550 = vmatprep.subr.bf16.mxu0 %v3901_v8  ;;  %3875 = vmatprep.subr.bf16.mxu1 %v3901_v8 }
  0x77   :  { %3551 = vmatpush3.bf16.msra.mxu0 %v3901_v8  ;;  %3883 = vmatpush3.bf16.msra.mxu1 %v3901_v8  ;;  %v3987_v8 = vld [vmem:[#allocation2 + $0x348] sm:$0xff]  }
  0x7a   :  { %3553 = vmatmul.mubr.bf16.vlgmr.msra.gmra.mrb[0].mxu0 %v3903_v9  ;;  %3701 = vmatmul.mubr.bf16.vlgmr.msra.gmra.mrb[0].mxu1 %v3927_v12  ;;  %v3990_v9 = vld [vmem:[#allocation2 + $0x350] sm:$0xff]   ;;  %v3991_v12 = vld [vmem:[#allocation2 + $0x358] sm:$0xff]  }
  0x7b   :  { %3556 = vmatprep.mubr.bf16.mxu0 %v3904_v10  ;;  %3704 = vmatprep.mubr.bf16.mxu1 %v3930_v13  ;;  %v3945_v10 = vld [vmem:[#allocation2 + $0x108] sm:$0xff]   ;;  %v3994_v13 = vld [vmem:[#allocation2 + $0x360] sm:$0xff]  }
  0x82   :  { %3557 = vmatmul.mubr.bf16.gmra.mrb[4].mxu0 %v3905_v14  ;;  %3705 = vmatmul.mubr.bf16.gmra.mrb[4].mxu1 %v3931_v16  ;;  %v3949_v14 = vld [vmem:[#allocation2 + $0x118] sm:$0xff]   ;;  %v3995_v16 = vld [vmem:[#allocation2 + $0x368] sm:$0xff]  }
  0x83   :  { %3560 = vmatprep.mubr.bf16.mxu0 %v3906_v15  ;;  %3708 = vmatprep.mubr.bf16.mxu1 %v3934_v17  ;;  %v3952_v15 = vld [vmem:[#allocation2 + $0x120] sm:$0xff]   ;;  %v3998_v17 = vld [vmem:[#allocation2 + $0x370] sm:$0xff]  }
  0x8a   :  { %3561 = vmatmul.mubr.bf16.gmra.mrb[8].mxu0 %v3907_v18  ;;  %3709 = vmatmul.mubr.bf16.gmra.mrb[8].mxu1 %v3935_v20  ;;  %v3953_v18 = vld [vmem:[#allocation2 + $0x128] sm:$0xff]   ;;  %v3999_v20 = vld [vmem:[#allocation2 + $0x378] sm:$0xff]  }
  0x8b   :  { %3564 = vmatprep.mubr.bf16.mxu0 %v3908_v19  ;;  %3712 = vmatprep.mubr.bf16.mxu1 %v3938_v21  ;;  %v3956_v19 = vld [vmem:[#allocation2 + $0x130] sm:$0xff]   ;;  %v4002_v21 = vld [vmem:[#allocation2 + $0x380] sm:$0xff]  }
  0x92   :  { %3565 = vmatmul.mubr.bf16.gmra.mrb[12].mxu0 %v3909_v22  ;;  %3713 = vmatmul.mubr.bf16.gmra.mrb[12].mxu1 %v3939_v24  ;;  %v3957_v22 = vld [vmem:[#allocation2 + $0x138] sm:$0xff]   ;;  %v4003_v24 = vld [vmem:[#allocation2 + $0x388] sm:$0xff]  }
  0x93   :  { %3568 = vmatprep.mubr.bf16.mxu0 %v3910_v23  ;;  %3716 = vmatprep.mubr.bf16.mxu1 %v3942_v25  ;;  %v3960_v23 = vld [vmem:[#allocation2 + $0x140] sm:$0xff]   ;;  %v4006_v25 = vld [vmem:[#allocation2 + $0x390] sm:$0xff]  }
  0x9a   :  { %3569 = vmatmul.mubr.bf16.gmra.mrb[16].mxu0 %v3911_v26  ;;  %3717 = vmatmul.mubr.bf16.gmra.mrb[16].mxu1 %v3943_v28  ;;  %v3961_v26 = vld [vmem:[#allocation2 + $0x148] sm:$0xff]   ;;  %v4007_v28 = vld [vmem:[#allocation2 + $0x398] sm:$0xff]  }
  0x9b   :  { %3572 = vmatprep.mubr.bf16.mxu0 %v3912_v27  ;;  %3720 = vmatprep.mubr.bf16.mxu1 %v3946_v29  ;;  %v3964_v27 = vld [vmem:[#allocation2 + $0x150] sm:$0xff]   ;;  %v4010_v29 = vld [vmem:[#allocation2 + $0x3a0] sm:$0xff]  }
  0xa2   :  { %3573 = vmatmul.mubr.bf16.gmra.mrb[20].mxu0 %v3913_v30  ;;  %3721 = vmatmul.mubr.bf16.gmra.mrb[20].mxu1 %v3947_v32  ;;  %v3965_v30 = vld [vmem:[#allocation2 + $0x158] sm:$0xff]   ;;  %v4011_v32 = vld [vmem:[#allocation2 + $0x3a8] sm:$0xff]  }
  0xa3   :  { %3576 = vmatprep.mubr.bf16.mxu0 %v3914_v31  ;;  %3724 = vmatprep.mubr.bf16.mxu1 %v3950_v33  ;;  %v3968_v31 = vld [vmem:[#allocation2 + $0x160] sm:$0xff]   ;;  %v4014_v33 = vld [vmem:[#allocation2 + $0x3b0] sm:$0xff]  }
  0xaa   :  { %3577 = vmatmul.mubr.bf16.gmra.mrb[24].mxu0 %v3915_v34  ;;  %3725 = vmatmul.mubr.bf16.gmra.mrb[24].mxu1 %v3951_v36  ;;  %v3969_v34 = vld [vmem:[#allocation2 + $0x168] sm:$0xff]   ;;  %v4015_v36 = vld [vmem:[#allocation2 + $0x3b8] sm:$0xff]  }
  0xab   :  { %3580 = vmatprep.mubr.bf16.mxu0 %v3916_v35  ;;  %3728 = vmatprep.mubr.bf16.mxu1 %v3954_v37  ;;  %v3972_v35 = vld [vmem:[#allocation2 + $0x170] sm:$0xff]   ;;  %v4018_v37 = vld [vmem:[#allocation2 + $0x3c0] sm:$0xff]  }
  0xb2   :  { %3581 = vmatmul.mubr.bf16.gmra.mrb[28].mxu0 %v3917_v38  ;;  %3729 = vmatmul.mubr.bf16.gmra.mrb[28].mxu1 %v3955_v40  ;;  %v3973_v38 = vld [vmem:[#allocation2 + $0x178] sm:$0xff]   ;;  %v4019_v40 = vld [vmem:[#allocation2 + $0x3c8] sm:$0xff]  }
  0xb3   :  { %3584 = vmatprep.mubr.bf16.mxu0 %v3918_v39  ;;  %3732 = vmatprep.mubr.bf16.mxu1 %v3958_v41  ;;  %v3976_v39 = vld [vmem:[#allocation2 + $0x180] sm:$0xff]   ;;  %v4022_v41 = vld [vmem:[#allocation2 + $0x3d0] sm:$0xff]  }
  0xba   :  { %3585 = vmatmul.mubr.bf16.gmra.mrb[32].mxu0 %v3919_v42  ;;  %3733 = vmatmul.mubr.bf16.gmra.mrb[32].mxu1 %v3959_v44  ;;  %v3977_v42 = vld [vmem:[#allocation2 + $0x188] sm:$0xff]   ;;  %v4023_v44 = vld [vmem:[#allocation2 + $0x3d8] sm:$0xff]  }
  0xbb   :  { %3588 = vmatprep.mubr.bf16.mxu0 %v3920_v43  ;;  %3736 = vmatprep.mubr.bf16.mxu1 %v3962_v45  ;;  %v3980_v43 = vld [vmem:[#allocation2 + $0x190] sm:$0xff]   ;;  %v4026_v45 = vld [vmem:[#allocation2 + $0x3e0] sm:$0xff]  }
  0xc2   :  { %3589 = vmatmul.mubr.bf16.gmra.mrb[36].mxu0 %v3921_v46  ;;  %3737 = vmatmul.mubr.bf16.gmra.mrb[36].mxu1 %v3963_v48  ;;  %v3981_v46 = vld [vmem:[#allocation2 + $0x198] sm:$0xff]   ;;  %v4027_v48 = vld [vmem:[#allocation2 + $0x3e8] sm:$0xff]  }
  0xc3   :  { %3592 = vmatprep.mubr.bf16.mxu0 %v3922_v47  ;;  %3740 = vmatprep.mubr.bf16.mxu1 %v3966_v49  ;;  %v3984_v47 = vld [vmem:[#allocation2 + $0x1a0] sm:$0xff]   ;;  %v4028_v49 = vld [vmem:[#allocation2 + $0x3f0] sm:$0xff]  }
  0xca   :  { %3593 = vmatmul.mubr.bf16.gmra.mrb[40].mxu0 %v3923_v50  ;;  %3741 = vmatmul.mubr.bf16.gmra.mrb[40].mxu1 %v3967_v52  ;;  %v3985_v50 = vld [vmem:[#allocation2 + $0x1a8] sm:$0xff]   ;;  %v4029_v52 = vld [vmem:[#allocation2 + $0x3f8] sm:$0xff]  }
  0xcb   :  { %3596 = vmatprep.mubr.bf16.mxu0 %v3924_v51  ;;  %3744 = vmatprep.mubr.bf16.mxu1 %v3970_v53  ;;  %v3988_v51 = vld [vmem:[#allocation2 + $0x1b0] sm:$0xff]   ;;  %v4348_v53 = vld [vmem:[%s4731_s2] ss:$0 sm:$0xff] }
  0xd2   :  { %3597 = vmatmul.mubr.bf16.gmra.mrb[44].mxu0 %v3925_v54  ;;  %3745 = vmatmul.mubr.bf16.gmra.mrb[44].mxu1 %v3971_v56  ;;  %v3989_v56 = vld [vmem:[#allocation2 + $0x1b8] sm:$0xff]  }
  0xd3   :  { %3600 = vmatprep.mubr.bf16.mxu0 %v3928_v55  ;;  %3748 = vmatprep.mubr.bf16.mxu1 %v3974_v57 }
  0xda   :  { %3601 = vmatmul.mubr.bf16.gmra.mrb[48].mxu0 %v3929_v58  ;;  %3749 = vmatmul.mubr.bf16.gmra.mrb[48].mxu1 %v3975_v60  ;;  %v3992_v60 = vld [vmem:[#allocation2 + $0x1c0] sm:$0xff]  }
  0xdb   :  { %3604 = vmatprep.mubr.bf16.mxu0 %v3932_v59  ;;  %3752 = vmatprep.mubr.bf16.mxu1 %v3978_v61 }
  0xe2   :  { %3605 = vmatmul.mubr.bf16.gmra.mrb[52].mxu0 %v3933_v62  ;;  %3753 = vmatmul.mubr.bf16.gmra.mrb[52].mxu1 %v3979_v0 }
  0xe3   :  { %3608 = vmatprep.mubr.bf16.mxu0 %v3936_v63  ;;  %3756 = vmatprep.mubr.bf16.mxu1 %v3982_v1 }
  0xea   :  { %3609 = vmatmul.mubr.bf16.gmra.mrb[56].mxu0 %v3937_v2  ;;  %3757 = vmatmul.mubr.bf16.gmra.mrb[56].mxu1 %v3983_v4 }
  0xeb   :  { %3612 = vmatprep.mubr.bf16.mxu0 %v3940_v3  ;;  %3760 = vmatprep.mubr.bf16.mxu1 %v3986_v5 }
  0xf2   :  { %3613 = vmatmul.mubr.bf16.gmra.mrb[60].mxu0 %v3941_v6  ;;  %3761 = vmatmul.mubr.bf16.gmra.mrb[60].mxu1 %v3987_v8 }
  0xf3   :  { %3616 = vmatprep.mubr.bf16.mxu0 %v3944_v7  ;;  %3764 = vmatprep.mubr.bf16.mxu1 %v3990_v9 }
  0xfa   :  { %3617 = vmatmul.mubr.bf16.gmra.mrb[64].mxu0 %v3945_v10  ;;  %3765 = vmatmul.mubr.bf16.gmra.mrb[64].mxu1 %v3991_v12  ;;  %v3993_v10 = vld [vmem:[#allocation2 + $0x1c8] sm:$0xff]  }
  0xfb   :  { %3620 = vmatprep.mubr.bf16.mxu0 %v3948_v11  ;;  %3768 = vmatprep.mubr.bf16.mxu1 %v3994_v13 }
 0x102   :  { %3621 = vmatmul.mubr.bf16.gmra.mrb[68].mxu0 %v3949_v14  ;;  %3769 = vmatmul.mubr.bf16.gmra.mrb[68].mxu1 %v3995_v16  ;;  %v3996_v16 = vld [vmem:[#allocation2 + $0x1d0] sm:$0xff]  }
 0x103   :  { %3624 = vmatprep.mubr.bf16.mxu0 %v3952_v15  ;;  %3772 = vmatprep.mubr.bf16.mxu1 %v3998_v17 }
 0x10a   :  { %3625 = vmatmul.mubr.bf16.gmra.mrb[72].mxu0 %v3953_v18  ;;  %3773 = vmatmul.mubr.bf16.gmra.mrb[72].mxu1 %v3999_v20 }
 0x10b   :  { %3628 = vmatprep.mubr.bf16.mxu0 %v3956_v19  ;;  %3776 = vmatprep.mubr.bf16.mxu1 %v4002_v21 }
 0x112   :  { %3629 = vmatmul.mubr.bf16.gmra.mrb[76].mxu0 %v3957_v22  ;;  %3777 = vmatmul.mubr.bf16.gmra.mrb[76].mxu1 %v4003_v24 }
 0x113   :  { %3632 = vmatprep.mubr.bf16.mxu0 %v3960_v23  ;;  %3780 = vmatprep.mubr.bf16.mxu1 %v4006_v25 }
 0x11a   :  { %3633 = vmatmul.mubr.bf16.gmra.mrb[80].mxu0 %v3961_v26  ;;  %3781 = vmatmul.mubr.bf16.gmra.mrb[80].mxu1 %v4007_v28 }
 0x11b   :  { %3636 = vmatprep.mubr.bf16.mxu0 %v3964_v27  ;;  %3784 = vmatprep.mubr.bf16.mxu1 %v4010_v29 }
 0x122   :  { %3637 = vmatmul.mubr.bf16.gmra.mrb[84].mxu0 %v3965_v30  ;;  %3785 = vmatmul.mubr.bf16.gmra.mrb[84].mxu1 %v4011_v32  ;;  %v3997_v32 = vld [vmem:[#allocation2 + $0x1d8] sm:$0xff]  }
 0x123   :  { %3640 = vmatprep.mubr.bf16.mxu0 %v3968_v31  ;;  %3788 = vmatprep.mubr.bf16.mxu1 %v4014_v33 }
 0x12a   :  { %3641 = vmatmul.mubr.bf16.gmra.mrb[88].mxu0 %v3969_v34  ;;  %3789 = vmatmul.mubr.bf16.gmra.mrb[88].mxu1 %v4015_v36 }
 0x12b   :  { %3644 = vmatprep.mubr.bf16.mxu0 %v3972_v35  ;;  %3792 = vmatprep.mubr.bf16.mxu1 %v4018_v37 }
 0x132   :  { %3645 = vmatmul.mubr.bf16.gmra.mrb[92].mxu0 %v3973_v38  ;;  %3793 = vmatmul.mubr.bf16.gmra.mrb[92].mxu1 %v4019_v40  ;;  %v4000_v38 = vld [vmem:[#allocation2 + $0x1e0] sm:$0xff]  }
 0x133   :  { %3648 = vmatprep.mubr.bf16.mxu0 %v3976_v39  ;;  %3796 = vmatprep.mubr.bf16.mxu1 %v4022_v41 }
 0x13a   :  { %3649 = vmatmul.mubr.bf16.gmra.mrb[96].mxu0 %v3977_v42  ;;  %3797 = vmatmul.mubr.bf16.gmra.mrb[96].mxu1 %v4023_v44 }
 0x13b   :  { %3652 = vmatprep.mubr.bf16.mxu0 %v3980_v43  ;;  %3800 = vmatprep.mubr.bf16.mxu1 %v4026_v45 }
 0x142   :  { %3653 = vmatmul.mubr.bf16.gmra.mrb[100].mxu0 %v3981_v46  ;;  %3801 = vmatmul.mubr.bf16.gmra.mrb[100].mxu1 %v4027_v48 }
 0x143   :  { %3656 = vmatprep.mubr.bf16.mxu0 %v3984_v47  ;;  %3804 = vmatprep.mubr.bf16.mxu1 %v4028_v49 }
 0x14a   :  { %3657 = vmatmul.mubr.bf16.gmra.mrb[104].mxu0 %v3985_v50  ;;  %3805 = vmatmul.mubr.bf16.gmra.mrb[104].mxu1 %v4029_v52 }
 0x14b   :  { %3660 = vmatprep.mubr.bf16.mxu0 %v3988_v51 }
 0x14d   :  { %v3554_v54 = vpop.f32.mrb[0].mxu0  ;;  %v4350_v57 = vpop.f32.mrb[0].mxu1 }
 0x14e   :  { %v1231_v55 = vpop.f32.mrb[1].mxu0  ;;  %v4353_v61 = vpop.f32.mrb[1].mxu1  ;;  %v1240_v0 = vadd.f32 %v3554_v54, %v4348_v53  ;;  %v4030_v54 = vld [vmem:[#allocation7] sm:$0xff]  }
 0x14f   :  { %v1232_v58 = vadd.f32 %v4348_v53, %v1231_v55  ;;  %v3555_v59 = vpop.f32.mrb[2].mxu0  ;;  %v4355_v63 = vpop.f32.mrb[2].mxu1 }
 0x150   :  { %v1234_v62 = vpop.f32.mrb[3].mxu0  ;;  %v4359_v2 = vpop.f32.mrb[3].mxu1  ;;  %v1243_v4 = vadd.f32 %v3555_v59, %v4348_v53  ;;  %v2256_v6 = vmax.f32 %v1240_v0, 0.0  ;;  %v4203_v59 = vmov 0.0  }
 0x151   :  { %v1235_v1 = vadd.f32 %v4348_v53, %v1234_v62  ;;  %v2254_v3 = vmax.f32 %v1232_v58, 0.0  ;;  %3808 = vmatprep.subr.bf16.mxu1 %v4203_v59  ;;  %3824 = vmatprep.mubr.msk.bf16.mxu1 %vm4204_vm1, %v4203_v59 }
 0x152   :  { %3661 = vmatmul.mubr.bf16.gmra.mrb[108].mxu0 %v3989_v56  ;;  %v2257_v12 = vmax.f32 %v1243_v4, 0.0  ;;  %v4001_v56 = vld [vmem:[#allocation2 + $0x1e8] sm:$0xff]   ;;  %3809 = vmatpush3.bf16.msra.mxu1 %v4030_v54 }
 0x153   :  { %v2255_v5 = vmax.f32 %v1235_v1, 0.0  ;;  %3664 = vmatprep.mubr.bf16.mxu0 %v3992_v60  ;;  %3810 = vmatprep.subr.bf16.mxu1 %v4203_v59 }
 0x155   :  { %v2510_v7 = vadd.f32 %v2255_v5, %v2254_v3  ;;  %v3558_v8 = vpop.f32.mrb[4].mxu0  ;;  %v4362_v11 = vpop.f32.mrb[4].mxu1  ;;  %v4004_v3 = vld [vmem:[#allocation2 + $0x1f0] sm:$0xff]  }
 0x156   :  { %v1247_v9 = vpop.f32.mrb[5].mxu0  ;;  %v4365_v17 = vpop.f32.mrb[5].mxu1  ;;  %v1256_v20 = vadd.f32 %v3558_v8, %v4348_v53 }
 0x157   :  { %v2511_v13 = vadd.f32 %v2510_v7, %v2256_v6  ;;  %v1248_v14 = vadd.f32 %v4348_v53, %v1247_v9  ;;  %v3559_v15 = vpop.f32.mrb[6].mxu0  ;;  %v4367_v19 = vpop.f32.mrb[6].mxu1 }
 0x158   :  { %v1250_v18 = vpop.f32.mrb[7].mxu0  ;;  %v4371_v24 = vpop.f32.mrb[7].mxu1  ;;  %v1259_v26 = vadd.f32 %v3559_v15, %v4348_v53  ;;  %v2260_v28 = vmax.f32 %v1256_v20, 0.0 }
 0x159   :  { %v2258_v21 = vmax.f32 %v1248_v14, 0.0  ;;  %v2512_v22 = vadd.f32 %v2511_v13, %v2257_v12  ;;  %v1251_v23 = vadd.f32 %v4348_v53, %v1250_v18 }
 0x15a   :  { %3665 = vmatmul.mubr.bf16.gmra.mrb[112].mxu0 %v3993_v10  ;;  %v2261_v34 = vmax.f32 %v1259_v26, 0.0 }
 0x15b   :  { %v2513_v25 = vadd.f32 %v2512_v22, %v2258_v21  ;;  %v2259_v27 = vmax.f32 %v1251_v23, 0.0  ;;  %3668 = vmatprep.mubr.bf16.mxu0 %v3996_v16 }
 0x15d   :  { %v2514_v29 = vadd.f32 %v2513_v25, %v2259_v27  ;;  %v3562_v30 = vpop.f32.mrb[8].mxu0  ;;  %v4374_v33 = vpop.f32.mrb[8].mxu1 }
 0x15e   :  { %v1263_v31 = vpop.f32.mrb[9].mxu0  ;;  %v4377_v39 = vpop.f32.mrb[9].mxu1  ;;  %v1272_v42 = vadd.f32 %v3562_v30, %v4348_v53  ;;  %v4005_v30 = vld [vmem:[#allocation2 + $0x1f8] sm:$0xff]  }
 0x15f   :  { %v2515_v35 = vadd.f32 %v2514_v29, %v2260_v28  ;;  %v1264_v36 = vadd.f32 %v4348_v53, %v1263_v31  ;;  %v3563_v37 = vpop.f32.mrb[10].mxu0  ;;  %v4379_v41 = vpop.f32.mrb[10].mxu1 }
 0x160   :  { %v1266_v40 = vpop.f32.mrb[11].mxu0  ;;  %v4383_v46 = vpop.f32.mrb[11].mxu1  ;;  %v1275_v48 = vadd.f32 %v3563_v37, %v4348_v53  ;;  %v2264_v50 = vmax.f32 %v1272_v42, 0.0 }
 0x161   :  { %v2262_v43 = vmax.f32 %v1264_v36, 0.0  ;;  %v2516_v44 = vadd.f32 %v2515_v35, %v2261_v34  ;;  %v1267_v45 = vadd.f32 %v4348_v53, %v1266_v40  ;;  %v4008_v40 = vld [vmem:[#allocation2 + $0x200] sm:$0xff]  }
 0x162   :  { %3669 = vmatmul.mubr.bf16.gmra.mrb[116].mxu0 %v3997_v32  ;;  %v2265_v60 = vmax.f32 %v1275_v48, 0.0 }
 0x163   :  { %v2517_v47 = vadd.f32 %v2516_v44, %v2262_v43  ;;  %v2263_v49 = vmax.f32 %v1267_v45, 0.0  ;;  %3672 = vmatprep.mubr.bf16.mxu0 %v4000_v38 }
 0x165   :  { %v2518_v51 = vadd.f32 %v2517_v47, %v2263_v49  ;;  %v3566_v52 = vpop.f32.mrb[12].mxu0  ;;  %v3714_v58 = vpop.f32.mrb[12].mxu1 }
 0x166   :  { %v1279_v55 = vpop.f32.mrb[13].mxu0  ;;  %v1871_v4 = vpop.f32.mrb[13].mxu1  ;;  %v1880_v6 = vadd.f32 %v3714_v58, %v4348_v53  ;;  %v1288_v9 = vadd.f32 %v3566_v52, %v4348_v53 }
 0x167   :  { %v2519_v62 = vadd.f32 %v2518_v51, %v2264_v50  ;;  %v1280_v0 = vadd.f32 %v4348_v53, %v1279_v55  ;;  %v3567_v1 = vpop.f32.mrb[14].mxu0  ;;  %v1872_v7 = vadd.f32 %v4348_v53, %v1871_v4  ;;  %v3715_v8 = vpop.f32.mrb[14].mxu1 }
 0x168   :  { %v1282_v5 = vpop.f32.mrb[15].mxu0  ;;  %v1874_v14 = vpop.f32.mrb[15].mxu1  ;;  %v1883_v16 = vadd.f32 %v3715_v8, %v4348_v53  ;;  %v1291_v21 = vadd.f32 %v3567_v1, %v4348_v53  ;;  %v2416_v23 = vmax.f32 %v1880_v6, 0.0  ;;  %v2268_v26 = vmax.f32 %v1288_v9, 0.0 }
 0x169   :  { %v2266_v10 = vmax.f32 %v1280_v0, 0.0  ;;  %v2520_v12 = vadd.f32 %v2519_v62, %v2265_v60  ;;  %v1283_v13 = vadd.f32 %v4348_v53, %v1282_v5  ;;  %v2414_v15 = vmax.f32 %v1872_v7, 0.0 }
 0x16a   :  { %3673 = vmatmul.mubr.bf16.gmra.mrb[120].mxu0 %v4001_v56  ;;  %v1875_v18 = vadd.f32 %v4348_v53, %v1874_v14  ;;  %v2417_v31 = vmax.f32 %v1883_v16, 0.0  ;;  %v2269_v35 = vmax.f32 %v1291_v21, 0.0 }
 0x16b   :  { %v2521_v20 = vadd.f32 %v2520_v12, %v2266_v10  ;;  %v2267_v22 = vmax.f32 %v1283_v13, 0.0  ;;  %3676 = vmatprep.mubr.bf16.mxu0 %v4004_v3  ;;  %v4031_v3 = vld [vmem:[#allocation7 + $0x8] sm:$0xff]  }
 0x16c   :  { %v2415_v25 = vmax.f32 %v1875_v18, 0.0  ;;  %3811 = vmatpush3.bf16.msra.mxu1 %v4031_v3  ;;  %v4009_v13 = vld [vmem:[#allocation2 + $0x208] sm:$0xff]  }
 0x16d   :  { %v2522_v27 = vadd.f32 %v2521_v20, %v2267_v22  ;;  %v3570_v28 = vpop.f32.mrb[16].mxu0  ;;  %v3718_v34 = vpop.f32.mrb[16].mxu1  ;;  %3812 = vmatprep.subr.bf16.mxu1 %v4203_v59  ;;  %v4012_v20 = vld [vmem:[#allocation2 + $0x210] sm:$0xff]  }
 0x16e   :  { %v1295_v29 = vpop.f32.mrb[17].mxu0  ;;  %v2695_v32 = vadd.f32 %v2415_v25, %v2414_v15  ;;  %v1887_v42 = vpop.f32.mrb[17].mxu1  ;;  %v1304_v43 = vadd.f32 %v3570_v28, %v4348_v53  ;;  %v1896_v52 = vadd.f32 %v3718_v34, %v4348_v53 }
 0x16f   :  { %v2523_v36 = vadd.f32 %v2522_v27, %v2268_v26  ;;  %v1296_v37 = vadd.f32 %v4348_v53, %v1295_v29  ;;  %v3571_v38 = vpop.f32.mrb[18].mxu0  ;;  %v1888_v47 = vadd.f32 %v4348_v53, %v1887_v42  ;;  %v3719_v48 = vpop.f32.mrb[18].mxu1 }
 0x170   :  { %v1298_v44 = vpop.f32.mrb[19].mxu0  ;;  %v2696_v45 = vadd.f32 %v2695_v32, %v2416_v23  ;;  %v1890_v54 = vpop.f32.mrb[19].mxu1  ;;  %v1307_v55 = vadd.f32 %v3571_v38, %v4348_v53  ;;  %v1899_v0 = vadd.f32 %v3719_v48, %v4348_v53  ;;  %v2272_v5 = vmax.f32 %v1304_v43, 0.0 }
 0x171   :  { %v2270_v49 = vmax.f32 %v1296_v37, 0.0  ;;  %v2524_v50 = vadd.f32 %v2523_v36, %v2269_v35  ;;  %v1299_v51 = vadd.f32 %v4348_v53, %v1298_v44  ;;  %v2418_v56 = vmax.f32 %v1888_v47, 0.0 }
 0x172   :  { %3677 = vmatmul.mubr.bf16.gmra.mrb[124].mxu0 %v4005_v30  ;;  %v2697_v58 = vadd.f32 %v2696_v45, %v2417_v31  ;;  %v1891_v1 = vadd.f32 %v4348_v53, %v1890_v54  ;;  %v2420_v8 = vmax.f32 %v1896_v52, 0.0  ;;  %v2273_v10 = vmax.f32 %v1307_v55, 0.0  ;;  %v4013_v55 = vld [vmem:[#allocation2 + $0x218] sm:$0xff]  }
 0x173   :  { %v2525_v60 = vadd.f32 %v2524_v50, %v2270_v49  ;;  %v2271_v62 = vmax.f32 %v1299_v51, 0.0  ;;  %3680 = vmatprep.mubr.bf16.mxu0 %v4008_v40  ;;  %v2421_v21 = vmax.f32 %v1899_v0, 0.0  ;;  %v4016_v0 = vld [vmem:[#allocation2 + $0x220] sm:$0xff]  }
 0x174   :  { %v2698_v4 = vadd.f32 %v2697_v58, %v2418_v56  ;;  %v2419_v9 = vmax.f32 %v1891_v1, 0.0 }
 0x175   :  { %v2526_v6 = vadd.f32 %v2525_v60, %v2271_v62  ;;  %v3574_v7 = vpop.f32.mrb[20].mxu0  ;;  %v3722_v14 = vpop.f32.mrb[20].mxu1 }
 0x176   :  { %v1311_v12 = vpop.f32.mrb[21].mxu0  ;;  %v2699_v22 = vadd.f32 %v2698_v4, %v2419_v9  ;;  %v1903_v23 = vpop.f32.mrb[21].mxu1  ;;  %v1320_v25 = vadd.f32 %v3574_v7, %v4348_v53  ;;  %v1912_v27 = vadd.f32 %v3722_v14, %v4348_v53 }
 0x177   :  { %v2527_v15 = vadd.f32 %v2526_v6, %v2272_v5  ;;  %v1312_v16 = vadd.f32 %v4348_v53, %v1311_v12  ;;  %v3575_v18 = vpop.f32.mrb[22].mxu0  ;;  %v1904_v28 = vadd.f32 %v4348_v53, %v1903_v23  ;;  %v3723_v29 = vpop.f32.mrb[22].mxu1 }
 0x178   :  { %v1314_v26 = vpop.f32.mrb[23].mxu0  ;;  %v2700_v34 = vadd.f32 %v2699_v22, %v2420_v8  ;;  %v1906_v35 = vpop.f32.mrb[23].mxu1  ;;  %v1323_v36 = vadd.f32 %v3575_v18, %v4348_v53  ;;  %v1915_v38 = vadd.f32 %v3723_v29, %v4348_v53  ;;  %v2276_v45 = vmax.f32 %v1320_v25, 0.0 }
 0x179   :  { %v2274_v30 = vmax.f32 %v1312_v16, 0.0  ;;  %v2528_v31 = vadd.f32 %v2527_v15, %v2273_v10  ;;  %v1315_v32 = vadd.f32 %v4348_v53, %v1314_v26  ;;  %v2422_v37 = vmax.f32 %v1904_v28, 0.0 }
 0x17a   :  { %3681 = vmatmul.mubr.bf16.gmra.mrb[128].mxu0 %v4009_v13  ;;  %v2701_v43 = vadd.f32 %v2700_v34, %v2421_v21  ;;  %v1907_v44 = vadd.f32 %v4348_v53, %v1906_v35  ;;  %v2424_v49 = vmax.f32 %v1912_v27, 0.0  ;;  %v2277_v52 = vmax.f32 %v1323_v36, 0.0  ;;  %v4017_v35 = vld [vmem:[#allocation2 + $0x228] sm:$0xff]  }
 0x17b   :  { %v2529_v40 = vadd.f32 %v2528_v31, %v2274_v30  ;;  %v2275_v42 = vmax.f32 %v1315_v32, 0.0  ;;  %3684 = vmatprep.mubr.bf16.mxu0 %v4012_v20  ;;  %v2425_v1 = vmax.f32 %v1915_v38, 0.0 }
 0x17c   :  { %v2702_v50 = vadd.f32 %v2701_v43, %v2422_v37  ;;  %v2423_v51 = vmax.f32 %v1907_v44, 0.0 }
 0x17d   :  { %v2530_v47 = vadd.f32 %v2529_v40, %v2275_v42  ;;  %v3578_v48 = vpop.f32.mrb[24].mxu0  ;;  %v3726_v56 = vpop.f32.mrb[24].mxu1  ;;  %v4020_v42 = vld [vmem:[#allocation2 + $0x230] sm:$0xff]  }
 0x17e   :  { %v1327_v54 = vpop.f32.mrb[25].mxu0  ;;  %v2703_v3 = vadd.f32 %v2702_v50, %v2423_v51  ;;  %v1919_v4 = vpop.f32.mrb[25].mxu1  ;;  %v1336_v5 = vadd.f32 %v3578_v48, %v4348_v53  ;;  %v1928_v7 = vadd.f32 %v3726_v56, %v4348_v53 }
 0x17f   :  { %v2531_v58 = vadd.f32 %v2530_v47, %v2276_v45  ;;  %v1328_v60 = vadd.f32 %v4348_v53, %v1327_v54  ;;  %v3579_v62 = vpop.f32.mrb[26].mxu0  ;;  %v1920_v8 = vadd.f32 %v4348_v53, %v1919_v4  ;;  %v3727_v9 = vpop.f32.mrb[26].mxu1 }
 0x180   :  { %v1330_v6 = vpop.f32.mrb[27].mxu0  ;;  %v2704_v14 = vadd.f32 %v2703_v3, %v2424_v49  ;;  %v1922_v15 = vpop.f32.mrb[27].mxu1  ;;  %v1339_v16 = vadd.f32 %v3579_v62, %v4348_v53  ;;  %v1931_v20 = vadd.f32 %v3727_v9, %v4348_v53  ;;  %v2280_v26 = vmax.f32 %v1336_v5, 0.0 }
 0x181   :  { %v2278_v10 = vmax.f32 %v1328_v60, 0.0  ;;  %v2532_v12 = vadd.f32 %v2531_v58, %v2277_v52  ;;  %v1331_v13 = vadd.f32 %v4348_v53, %v1330_v6  ;;  %v2426_v18 = vmax.f32 %v1920_v8, 0.0 }
 0x182   :  { %3685 = vmatmul.mubr.bf16.gmra.mrb[132].mxu0 %v4013_v55  ;;  %v2705_v23 = vadd.f32 %v2704_v14, %v2425_v1  ;;  %v1923_v25 = vadd.f32 %v4348_v53, %v1922_v15  ;;  %v2428_v29 = vmax.f32 %v1928_v7, 0.0  ;;  %v2281_v32 = vmax.f32 %v1339_v16, 0.0  ;;  %v4021_v15 = vld [vmem:[#allocation2 + $0x238] sm:$0xff]  }
 0x183   :  { %v2533_v21 = vadd.f32 %v2532_v12, %v2278_v10  ;;  %v2279_v22 = vmax.f32 %v1331_v13, 0.0  ;;  %3688 = vmatprep.mubr.bf16.mxu0 %v4016_v0  ;;  %v2429_v43 = vmax.f32 %v1931_v20, 0.0 }
 0x184   :  { %v2706_v30 = vadd.f32 %v2705_v23, %v2426_v18  ;;  %v2427_v31 = vmax.f32 %v1923_v25, 0.0 }
 0x185   :  { %v2534_v27 = vadd.f32 %v2533_v21, %v2279_v22  ;;  %v3582_v28 = vpop.f32.mrb[28].mxu0  ;;  %v3730_v36 = vpop.f32.mrb[28].mxu1  ;;  %v4024_v22 = vld [vmem:[#allocation2 + $0x240] sm:$0xff]  }
 0x186   :  { %v1343_v34 = vpop.f32.mrb[29].mxu0  ;;  %v2707_v44 = vadd.f32 %v2706_v30, %v2427_v31  ;;  %v1935_v45 = vpop.f32.mrb[29].mxu1  ;;  %v1352_v47 = vadd.f32 %v3582_v28, %v4348_v53  ;;  %v1944_v49 = vadd.f32 %v3730_v36, %v4348_v53 }
 0x187   :  { %v2535_v37 = vadd.f32 %v2534_v27, %v2280_v26  ;;  %v1344_v38 = vadd.f32 %v4348_v53, %v1343_v34  ;;  %v3583_v40 = vpop.f32.mrb[30].mxu0  ;;  %v1936_v50 = vadd.f32 %v4348_v53, %v1935_v45  ;;  %v3731_v51 = vpop.f32.mrb[30].mxu1 }
 0x188   :  { %v1346_v48 = vpop.f32.mrb[31].mxu0  ;;  %v2708_v56 = vadd.f32 %v2707_v44, %v2428_v29  ;;  %v1938_v58 = vpop.f32.mrb[31].mxu1  ;;  %v1355_v60 = vadd.f32 %v3583_v40, %v4348_v53  ;;  %v1947_v0 = vadd.f32 %v3731_v51, %v4348_v53  ;;  %v2284_v6 = vmax.f32 %v1352_v47, 0.0 }
 0x189   :  { %v2282_v52 = vmax.f32 %v1344_v38, 0.0  ;;  %v2536_v54 = vadd.f32 %v2535_v37, %v2281_v32  ;;  %v1347_v55 = vadd.f32 %v4348_v53, %v1346_v48  ;;  %v2430_v62 = vmax.f32 %v1936_v50, 0.0 }
 0x18a   :  { %3689 = vmatmul.mubr.bf16.gmra.mrb[136].mxu0 %v4017_v35  ;;  %v2709_v4 = vadd.f32 %v2708_v56, %v2429_v43  ;;  %v1939_v5 = vadd.f32 %v4348_v53, %v1938_v58  ;;  %v2432_v9 = vmax.f32 %v1944_v49, 0.0  ;;  %v2285_v13 = vmax.f32 %v1355_v60, 0.0 }
 0x18b   :  { %v2537_v1 = vadd.f32 %v2536_v54, %v2282_v52  ;;  %v2283_v3 = vmax.f32 %v1347_v55, 0.0  ;;  %3692 = vmatprep.mubr.bf16.mxu0 %v4020_v42  ;;  %v2433_v23 = vmax.f32 %v1947_v0, 0.0  ;;  %v4025_v54 = vld [vmem:[#allocation2 + $0x248] sm:$0xff]  }
 0x18c   :  { %v2710_v10 = vadd.f32 %v2709_v4, %v2430_v62  ;;  %v2431_v12 = vmax.f32 %v1939_v5, 0.0 }
 0x18d   :  { %v2538_v7 = vadd.f32 %v2537_v1, %v2283_v3  ;;  %v3586_v8 = vpop.f32.mrb[32].mxu0  ;;  %v3734_v16 = vpop.f32.mrb[32].mxu1 }
 0x18e   :  { %v1359_v14 = vpop.f32.mrb[33].mxu0  ;;  %v2711_v25 = vadd.f32 %v2710_v10, %v2431_v12  ;;  %v1951_v26 = vpop.f32.mrb[33].mxu1  ;;  %v1368_v31 = vadd.f32 %v3586_v8, %v4348_v53  ;;  %v1960_v37 = vadd.f32 %v3734_v16, %v4348_v53 }
 0x18f   :  { %v2539_v18 = vadd.f32 %v2538_v7, %v2284_v6  ;;  %v1360_v20 = vadd.f32 %v4348_v53, %v1359_v14  ;;  %v3587_v21 = vpop.f32.mrb[34].mxu0  ;;  %v1952_v28 = vadd.f32 %v4348_v53, %v1951_v26  ;;  %v3735_v29 = vpop.f32.mrb[34].mxu1 }
 0x190   :  { %v1362_v27 = vpop.f32.mrb[35].mxu0  ;;  %v2712_v34 = vadd.f32 %v2711_v25, %v2432_v9  ;;  %v1954_v35 = vpop.f32.mrb[35].mxu1  ;;  %v1371_v36 = vadd.f32 %v3587_v21, %v4348_v53  ;;  %v1963_v45 = vadd.f32 %v3735_v29, %v4348_v53  ;;  %v2288_v47 = vmax.f32 %v1368_v31, 0.0 }
 0x191   :  { %v4431_v30 = vadd.f32 %v2539_v18, %v2285_v13  ;;  %v1363_v32 = vadd.f32 %v4348_v53, %v1362_v27  ;;  %v2434_v38 = vmax.f32 %v1952_v28, 0.0  ;;  %v2286_v40 = vmax.f32 %v1360_v20, 0.0 }
 0x192   :  { %3693 = vmatmul.mubr.bf16.gmra.mrb[140].mxu0 %v4021_v15  ;;  %v2713_v43 = vadd.f32 %v2712_v34, %v2433_v23  ;;  %v1955_v44 = vadd.f32 %v4348_v53, %v1954_v35  ;;  %v2436_v55 = vmax.f32 %v1960_v37, 0.0  ;;  %v2289_v58 = vmax.f32 %v1371_v36, 0.0 }
 0x193   :  { %v2287_v42 = vmax.f32 %v1363_v32, 0.0  ;;  %3696 = vmatprep.mubr.bf16.mxu0 %v4024_v22  ;;  %v2437_v5 = vmax.f32 %v1963_v45, 0.0 }
 0x194   :  { %v2714_v50 = vadd.f32 %v2713_v43, %v2434_v38  ;;  %v2435_v51 = vmax.f32 %v1955_v44, 0.0 }
 0x195   :  { %v2547_v48 = vadd.f32 %v2287_v42, %v2286_v40  ;;  %v3590_v49 = vpop.f32.mrb[36].mxu0  ;;  %v3738_v56 = vpop.f32.mrb[36].mxu1 }
 0x196   :  { %v1375_v52 = vpop.f32.mrb[37].mxu0  ;;  %v2715_v1 = vadd.f32 %v2714_v50, %v2435_v51  ;;  %v1967_v3 = vpop.f32.mrb[37].mxu1  ;;  %v1384_v8 = vadd.f32 %v3590_v49, %v4348_v53  ;;  %v1976_v15 = vadd.f32 %v3738_v56, %v4348_v53 }
 0x197   :  { %v2548_v60 = vadd.f32 %v2547_v48, %v2288_v47  ;;  %v1376_v62 = vadd.f32 %v4348_v53, %v1375_v52  ;;  %v3591_v0 = vpop.f32.mrb[38].mxu0  ;;  %v1968_v6 = vadd.f32 %v4348_v53, %v1967_v3  ;;  %v3739_v7 = vpop.f32.mrb[38].mxu1 }
 0x198   :  { %v1378_v4 = vpop.f32.mrb[39].mxu0  ;;  %v1970_v13 = vpop.f32.mrb[39].mxu1  ;;  %v2716_v14 = vadd.f32 %v2715_v1, %v2436_v55  ;;  %v1387_v20 = vadd.f32 %v3591_v0, %v4348_v53  ;;  %v1979_v23 = vadd.f32 %v3739_v7, %v4348_v53  ;;  %v2292_v26 = vmax.f32 %v1384_v8, 0.0  ;;  %v4032_v8 = vld [vmem:[#allocation7 + $0x10] sm:$0xff]  }
 0x199   :  { %v2290_v9 = vmax.f32 %v1376_v62, 0.0  ;;  %v2549_v10 = vadd.f32 %v2548_v60, %v2289_v58  ;;  %v1379_v12 = vadd.f32 %v4348_v53, %v1378_v4  ;;  %v2438_v16 = vmax.f32 %v1968_v6, 0.0  ;;  %3813 = vmatpush3.bf16.msra.mxu1 %v4032_v8 }
 0x19a   :  { %3697 = vmatmul.mubr.bf16.gmra.mrb[144].mxu0 %v4025_v54  ;;  %v2717_v22 = vadd.f32 %v2716_v14, %v2437_v5  ;;  %v1971_v25 = vadd.f32 %v4348_v53, %v1970_v13  ;;  %v2440_v31 = vmax.f32 %v1976_v15, 0.0  ;;  %v2293_v36 = vmax.f32 %v1387_v20, 0.0  ;;  %3814 = vmatprep.subr.bf16.mxu1 %v4203_v59 }
 0x19b   :  { %v2550_v18 = vadd.f32 %v2549_v10, %v2290_v9  ;;  %v2291_v21 = vmax.f32 %v1379_v12, 0.0  ;;  %v2441_v44 = vmax.f32 %v1979_v23, 0.0 }
 0x19c   :  { %v2718_v32 = vadd.f32 %v2717_v22, %v2438_v16  ;;  %v2439_v34 = vmax.f32 %v1971_v25, 0.0  ;;  %v4033_v22 = vld [vmem:[#allocation7 + $0x18] sm:$0xff]  }
 0x19d   :  { %v2551_v27 = vadd.f32 %v2550_v18, %v2291_v21  ;;  %v3594_v28 = vpop.f32.mrb[40].mxu0  ;;  %v3742_v35 = vpop.f32.mrb[40].mxu1  ;;  %3815 = vmatpush3.bf16.msra.mxu1 %v4033_v22 }
 0x19e   :  { %v1391_v29 = vpop.f32.mrb[41].mxu0  ;;  %v1983_v42 = vpop.f32.mrb[41].mxu1  ;;  %v2719_v45 = vadd.f32 %v2718_v32, %v2439_v34  ;;  %v1400_v49 = vadd.f32 %v3594_v28, %v4348_v53  ;;  %v1992_v56 = vadd.f32 %v3742_v35, %v4348_v53  ;;  %3816 = vmatprep.subr.bf16.mxu1 %v4203_v59 }
 0x19f   :  { %v2552_v37 = vadd.f32 %v2551_v27, %v2292_v26  ;;  %v1392_v38 = vadd.f32 %v4348_v53, %v1391_v29  ;;  %v3595_v40 = vpop.f32.mrb[42].mxu0  ;;  %v1984_v47 = vadd.f32 %v4348_v53, %v1983_v42  ;;  %v3743_v48 = vpop.f32.mrb[42].mxu1 }
 0x1a0   :  { %v1394_v43 = vpop.f32.mrb[43].mxu0  ;;  %v1986_v54 = vpop.f32.mrb[43].mxu1  ;;  %v2720_v55 = vadd.f32 %v2719_v45, %v2440_v31  ;;  %v1403_v62 = vadd.f32 %v3595_v40, %v4348_v53  ;;  %v1995_v3 = vadd.f32 %v3743_v48, %v4348_v53  ;;  %v2296_v5 = vmax.f32 %v1400_v49, 0.0 }
 0x1a1   :  { %v2294_v50 = vmax.f32 %v1392_v38, 0.0  ;;  %v2553_v51 = vadd.f32 %v2552_v37, %v2293_v36  ;;  %v1395_v52 = vadd.f32 %v4348_v53, %v1394_v43  ;;  %v2442_v58 = vmax.f32 %v1984_v47, 0.0 }
 0x1a2   :  { %v2721_v1 = vadd.f32 %v2720_v55, %v2441_v44  ;;  %v1987_v4 = vadd.f32 %v4348_v53, %v1986_v54  ;;  %v2444_v10 = vmax.f32 %v1992_v56, 0.0  ;;  %v2297_v15 = vmax.f32 %v1403_v62, 0.0 }
 0x1a3   :  { %v2554_v60 = vadd.f32 %v2553_v51, %v2294_v50  ;;  %v2295_v0 = vmax.f32 %v1395_v52, 0.0  ;;  %v2445_v26 = vmax.f32 %v1995_v3, 0.0 }
 0x1a4   :  { %v2722_v12 = vadd.f32 %v2721_v1, %v2442_v58  ;;  %v2443_v13 = vmax.f32 %v1987_v4, 0.0 }
 0x1a5   :  { %v2555_v6 = vadd.f32 %v2554_v60, %v2295_v0  ;;  %v3598_v7 = vpop.f32.mrb[44].mxu0  ;;  %v3746_v14 = vpop.f32.mrb[44].mxu1 }
 0x1a6   :  { %v1407_v9 = vpop.f32.mrb[45].mxu0  ;;  %v1999_v21 = vpop.f32.mrb[45].mxu1  ;;  %v1416_v23 = vadd.f32 %v3598_v7, %v4348_v53  ;;  %v2723_v27 = vadd.f32 %v2722_v12, %v2443_v13  ;;  %v2008_v35 = vadd.f32 %v3746_v14, %v4348_v53 }
 0x1a7   :  { %v2556_v16 = vadd.f32 %v2555_v6, %v2296_v5  ;;  %v1408_v18 = vadd.f32 %v4348_v53, %v1407_v9  ;;  %v3599_v20 = vpop.f32.mrb[46].mxu0  ;;  %v2000_v28 = vadd.f32 %v4348_v53, %v1999_v21  ;;  %v3747_v29 = vpop.f32.mrb[46].mxu1 }
 0x1a8   :  { %v1410_v25 = vpop.f32.mrb[47].mxu0  ;;  %v2002_v36 = vpop.f32.mrb[47].mxu1  ;;  %v1419_v37 = vadd.f32 %v3599_v20, %v4348_v53  ;;  %v2724_v38 = vadd.f32 %v2723_v27, %v2444_v10  ;;  %v2011_v44 = vadd.f32 %v3747_v29, %v4348_v53  ;;  %v2300_v48 = vmax.f32 %v1416_v23, 0.0 }
 0x1a9   :  { %v2298_v31 = vmax.f32 %v1408_v18, 0.0  ;;  %v2557_v32 = vadd.f32 %v2556_v16, %v2297_v15  ;;  %v1411_v34 = vadd.f32 %v4348_v53, %v1410_v25  ;;  %v2446_v40 = vmax.f32 %v2000_v28, 0.0 }
 0x1aa   :  { %v2003_v45 = vadd.f32 %v4348_v53, %v2002_v36  ;;  %v4464_v47 = vadd.f32 %v2724_v38, %v2445_v26  ;;  %v2448_v51 = vmax.f32 %v2008_v35, 0.0  ;;  %v2301_v54 = vmax.f32 %v1419_v37, 0.0 }
 0x1ab   :  { %v2558_v42 = vadd.f32 %v2557_v32, %v2298_v31  ;;  %v2299_v43 = vmax.f32 %v1411_v34, 0.0  ;;  %v2449_v0 = vmax.f32 %v2011_v44, 0.0 }
 0x1ac   :  { %v2447_v52 = vmax.f32 %v2003_v45, 0.0 }
 0x1ad   :  { %v2559_v49 = vadd.f32 %v2558_v42, %v2299_v43  ;;  %v3602_v50 = vpop.f32.mrb[48].mxu0  ;;  %v3750_v56 = vpop.f32.mrb[48].mxu1 }
 0x1ae   :  { %v1423_v55 = vpop.f32.mrb[49].mxu0  ;;  %v2732_v1 = vadd.f32 %v2447_v52, %v2446_v40  ;;  %v2015_v3 = vpop.f32.mrb[49].mxu1  ;;  %v1432_v4 = vadd.f32 %v3602_v50, %v4348_v53  ;;  %v2024_v14 = vadd.f32 %v3750_v56, %v4348_v53 }
 0x1af   :  { %v2560_v58 = vadd.f32 %v2559_v49, %v2300_v48  ;;  %v1424_v60 = vadd.f32 %v4348_v53, %v1423_v55  ;;  %v3603_v62 = vpop.f32.mrb[50].mxu0  ;;  %v2016_v6 = vadd.f32 %v4348_v53, %v2015_v3  ;;  %v3751_v7 = vpop.f32.mrb[50].mxu1 }
 0x1b0   :  { %v1426_v5 = vpop.f32.mrb[51].mxu0  ;;  %v2733_v12 = vadd.f32 %v2732_v1, %v2448_v51  ;;  %v2018_v13 = vpop.f32.mrb[51].mxu1  ;;  %v1435_v18 = vadd.f32 %v3603_v62, %v4348_v53  ;;  %v2027_v22 = vadd.f32 %v3751_v7, %v4348_v53  ;;  %v2304_v25 = vmax.f32 %v1432_v4, 0.0 }
 0x1b1   :  { %v2302_v8 = vmax.f32 %v1424_v60, 0.0  ;;  %v2561_v9 = vadd.f32 %v2560_v58, %v2301_v54  ;;  %v1427_v10 = vadd.f32 %v4348_v53, %v1426_v5  ;;  %v2450_v15 = vmax.f32 %v2016_v6, 0.0 }
 0x1b2   :  { %v2734_v21 = vadd.f32 %v2733_v12, %v2449_v0  ;;  %v2019_v23 = vadd.f32 %v4348_v53, %v2018_v13  ;;  %v2452_v31 = vmax.f32 %v2024_v14, 0.0  ;;  %v2305_v35 = vmax.f32 %v1435_v18, 0.0 }
 0x1b3   :  { %v2562_v16 = vadd.f32 %v2561_v9, %v2302_v8  ;;  %v2303_v20 = vmax.f32 %v1427_v10, 0.0  ;;  %v2453_v43 = vmax.f32 %v2027_v22, 0.0 }
 0x1b4   :  { %v2735_v28 = vadd.f32 %v2734_v21, %v2450_v15  ;;  %v2451_v32 = vmax.f32 %v2019_v23, 0.0  ;;  %v2541_v21 = vrot.slane %v4431_v30, 4 }
 0x1b5   :  { %v2563_v26 = vadd.f32 %v2562_v16, %v2303_v20  ;;  %v3606_v27 = vpop.f32.mrb[52].mxu0  ;;  %v3754_v34 = vpop.f32.mrb[52].mxu1 }
 0x1b6   :  { %v1439_v29 = vpop.f32.mrb[53].mxu0  ;;  %v2031_v40 = vpop.f32.mrb[53].mxu1  ;;  %v2736_v44 = vadd.f32 %v2735_v28, %v2451_v32  ;;  %v1448_v48 = vadd.f32 %v3606_v27, %v4348_v53  ;;  %v2040_v55 = vadd.f32 %v3754_v34, %v4348_v53 }
 0x1b7   :  { %v2564_v36 = vadd.f32 %v2563_v26, %v2304_v25  ;;  %v1440_v37 = vadd.f32 %v4348_v53, %v1439_v29  ;;  %v3607_v38 = vpop.f32.mrb[54].mxu0  ;;  %v3755_v45 = vpop.f32.mrb[54].mxu1  ;;  %v2032_v56 = vadd.f32 %v4348_v53, %v2031_v40 }
 0x1b8   :  { %v1442_v42 = vpop.f32.mrb[55].mxu0  ;;  %v2034_v52 = vpop.f32.mrb[55].mxu1  ;;  %v2737_v54 = vadd.f32 %v2736_v44, %v2452_v31  ;;  %v1451_v60 = vadd.f32 %v3607_v38, %v4348_v53  ;;  %v2043_v4 = vadd.f32 %v3755_v45, %v4348_v53  ;;  %v2308_v5 = vmax.f32 %v1448_v48, 0.0  ;;  %v4034_v44 = vld [vmem:[#allocation7 + $0x20] sm:$0xff]  }
 0x1b9   :  { %v2306_v49 = vmax.f32 %v1440_v37, 0.0  ;;  %v2565_v50 = vadd.f32 %v2564_v36, %v2305_v35  ;;  %v1443_v51 = vadd.f32 %v4348_v53, %v1442_v42  ;;  %v2035_v0 = vadd.f32 %v4348_v53, %v2034_v52  ;;  %3817 = vmatpush3.bf16.msra.mxu1 %v4034_v44 }
 0x1ba   :  { %v2454_v1 = vmax.f32 %v2032_v56, 0.0  ;;  %v2738_v3 = vadd.f32 %v2737_v54, %v2453_v43  ;;  %v2456_v10 = vmax.f32 %v2040_v55, 0.0  ;;  %v2309_v14 = vmax.f32 %v1451_v60, 0.0  ;;  %3818 = vmatprep.subr.bf16.mxu1 %v4203_v59 }
 0x1bb   :  { %v2566_v58 = vadd.f32 %v2565_v50, %v2306_v49  ;;  %v2307_v62 = vmax.f32 %v1443_v51, 0.0  ;;  %v2455_v8 = vmax.f32 %v2035_v0, 0.0  ;;  %v2457_v23 = vmax.f32 %v2043_v4, 0.0 }
 0x1bc   :  { %v2739_v12 = vadd.f32 %v2738_v3, %v2454_v1  ;;  %v2542_v45 = vadd.f32 %v2541_v21, %v4431_v30 }
 0x1bd   :  { %v2567_v6 = vadd.f32 %v2566_v58, %v2307_v62  ;;  %v3610_v7 = vpop.f32.mrb[56].mxu0  ;;  %v3758_v13 = vpop.f32.mrb[56].mxu1 }
 0x1be   :  { %v1455_v9 = vpop.f32.mrb[57].mxu0  ;;  %v2047_v20 = vpop.f32.mrb[57].mxu1  ;;  %v2740_v25 = vadd.f32 %v2739_v12, %v2455_v8  ;;  %v1464_v28 = vadd.f32 %v3610_v7, %v4348_v53  ;;  %v2056_v36 = vadd.f32 %v3758_v13, %v4348_v53  ;;  %v2543_v4 = vrot.slane %v2542_v45, 2 }
 0x1bf   :  { %v2568_v15 = vadd.f32 %v2567_v6, %v2308_v5  ;;  %v1456_v16 = vadd.f32 %v4348_v53, %v1455_v9  ;;  %v3611_v18 = vpop.f32.mrb[58].mxu0  ;;  %v2048_v26 = vadd.f32 %v4348_v53, %v2047_v20  ;;  %v3759_v27 = vpop.f32.mrb[58].mxu1 }
 0x1c0   :  { %v1458_v22 = vpop.f32.mrb[59].mxu0  ;;  %v2050_v34 = vpop.f32.mrb[59].mxu1  ;;  %v2741_v35 = vadd.f32 %v2740_v25, %v2456_v10  ;;  %v1467_v40 = vadd.f32 %v3611_v18, %v4348_v53  ;;  %v2059_v49 = vadd.f32 %v3759_v27, %v4348_v53  ;;  %v2312_v50 = vmax.f32 %v1464_v28, 0.0 }
 0x1c1   :  { %v2310_v29 = vmax.f32 %v1456_v16, 0.0  ;;  %v2569_v31 = vadd.f32 %v2568_v15, %v2309_v14  ;;  %v1459_v32 = vadd.f32 %v4348_v53, %v1458_v22  ;;  %v2458_v37 = vmax.f32 %v2048_v26, 0.0  ;;  %v4502_v22 = vld [vmem:[%s4731_s2] ss:$0 sm:$0xff] }
 0x1c2   :  { %v2051_v43 = vadd.f32 %v4348_v53, %v2050_v34  ;;  %v2742_v48 = vadd.f32 %v2741_v35, %v2457_v23  ;;  %v2460_v56 = vmax.f32 %v2056_v36, 0.0  ;;  %v2313_v62 = vmax.f32 %v1467_v40, 0.0 }
 0x1c3   :  { %v2570_v38 = vadd.f32 %v2569_v31, %v2310_v29  ;;  %v2311_v42 = vmax.f32 %v1459_v32, 0.0  ;;  %v2461_v6 = vmax.f32 %v2059_v49, 0.0  ;;  %v2544_v29 = vadd.f32 %v2543_v4, %v2542_v45 }
 0x1c4   :  { %v2459_v54 = vmax.f32 %v2051_v43, 0.0  ;;  %v2743_v58 = vadd.f32 %v2742_v48, %v2458_v37 }
 0x1c5   :  { %v2571_v51 = vadd.f32 %v2570_v38, %v2311_v42  ;;  %v3614_v52 = vpop.f32.mrb[60].mxu0  ;;  %v3762_v60 = vpop.f32.mrb[60].mxu1 }
 0x1c6   :  { %v1471_v55 = vpop.f32.mrb[61].mxu0  ;;  %v2063_v30 = vpop.f32.mrb[61].mxu1  ;;  %v2744_v7 = vadd.f32 %v2743_v58, %v2459_v54  ;;  %v1480_v10 = vadd.f32 %v3614_v52, %v4348_v53  ;;  %v2072_v18 = vadd.f32 %v3762_v60, %v4348_v53  ;;  %v2545_v54 = vrot.slane %v2544_v29, 1 }
 0x1c7   :  { %v2572_v0 = vadd.f32 %v2571_v51, %v2312_v50  ;;  %v1472_v1 = vadd.f32 %v4348_v53, %v1471_v55  ;;  %v3615_v3 = vpop.f32.mrb[62].mxu0  ;;  %v2064_v8 = vadd.f32 %v4348_v53, %v2063_v30  ;;  %v3763_v9 = vpop.f32.mrb[62].mxu1 }
 0x1c8   :  { %v1474_v5 = vpop.f32.mrb[63].mxu0  ;;  %v2066_v15 = vpop.f32.mrb[63].mxu1  ;;  %v2745_v16 = vadd.f32 %v2744_v7, %v2460_v56  ;;  %v1483_v23 = vadd.f32 %v4502_v22, %v3615_v3  ;;  %v2075_v28 = vadd.f32 %v4502_v22, %v3763_v9  ;;  %v2316_v31 = vmax.f32 %v1480_v10, 0.0 }
 0x1c9   :  { %v2314_v12 = vmax.f32 %v1472_v1, 0.0  ;;  %v2573_v13 = vadd.f32 %v2572_v0, %v2313_v62  ;;  %v1475_v14 = vadd.f32 %v4348_v53, %v1474_v5  ;;  %v2462_v20 = vmax.f32 %v2064_v8, 0.0 }
 0x1ca   :  { %v2067_v26 = vadd.f32 %v4502_v22, %v2066_v15  ;;  %v2746_v27 = vadd.f32 %v2745_v16, %v2461_v6  ;;  %v2464_v36 = vmax.f32 %v2072_v18, 0.0  ;;  %v2317_v40 = vmax.f32 %v1483_v23, 0.0 }
 0x1cb   :  { %v2574_v21 = vadd.f32 %v2573_v13, %v2314_v12  ;;  %v2315_v25 = vmax.f32 %v1475_v14, 0.0  ;;  %v2465_v50 = vmax.f32 %v2075_v28, 0.0  ;;  %v2546_v15 = vadd.f32 %v2545_v54, %v2544_v29 }
 0x1cc   :  { %v2463_v53 = vmax.f32 %v2067_v26, 0.0  ;;  %v2747_v37 = vadd.f32 %v2746_v27, %v2462_v20 }
 0x1cd   :  { %v2575_v32 = vadd.f32 %v2574_v21, %v2315_v25  ;;  %v3618_v34 = vpop.f32.mrb[64].mxu0  ;;  %v3766_v38 = vpop.f32.mrb[64].mxu1 }
 0x1ce   :  { %v1487_v35 = vpop.f32.mrb[65].mxu0  ;;  %v2079_v48 = vpop.f32.mrb[65].mxu1  ;;  %v2748_v51 = vadd.f32 %v2747_v37, %v2463_v53  ;;  %v1496_v56 = vadd.f32 %v4502_v22, %v3618_v34  ;;  %v2088_v1 = vadd.f32 %v4502_v22, %v3766_v38 }
 0x1cf   :  { %v2576_v42 = vadd.f32 %v2575_v32, %v2316_v31  ;;  %v1488_v43 = vadd.f32 %v4502_v22, %v1487_v35  ;;  %v3619_v44 = vpop.f32.mrb[66].mxu0  ;;  %v2080_v52 = vadd.f32 %v4502_v22, %v2079_v48  ;;  %v3767_v45 = vpop.f32.mrb[66].mxu1 }
 0x1d0   :  { %v1490_v49 = vpop.f32.mrb[67].mxu0  ;;  %v2082_v60 = vpop.f32.mrb[67].mxu1  ;;  %v1499_v62 = vadd.f32 %v4502_v22, %v3619_v44  ;;  %v2749_v0 = vadd.f32 %v2748_v51, %v2464_v36  ;;  %v2091_v8 = vadd.f32 %v4502_v22, %v3767_v45  ;;  %v2320_v10 = vmax.f32 %v1496_v56, 0.0 }
 0x1d1   :  { %v2577_v55 = vadd.f32 %v2576_v42, %v2317_v40  ;;  %v1491_v58 = vadd.f32 %v4502_v22, %v1490_v49  ;;  %v2466_v3 = vmax.f32 %v2080_v52, 0.0  ;;  %v2318_v4 = vmax.f32 %v1488_v43, 0.0 }
 0x1d2   :  { %v2083_v6 = vadd.f32 %v4502_v22, %v2082_v60  ;;  %v2750_v7 = vadd.f32 %v2749_v0, %v2465_v50  ;;  %v2468_v18 = vmax.f32 %v2088_v1, 0.0  ;;  %v2321_v25 = vmax.f32 %v1499_v62, 0.0 }
 0x1d3   :  { %v2578_v30 = vrot.slane %v2577_v55, 4  ;;  %v2319_v5 = vmax.f32 %v1491_v58, 0.0  ;;  %v2469_v53 = vmax.f32 %v2091_v8, 0.0  ;;  %v2806_v44 = vmul.f32 0.00390625, %v2546_v15 }
 0x1d4   :  { %v2467_v14 = vmax.f32 %v2083_v6, 0.0  ;;  %v2751_v20 = vadd.f32 %v2750_v7, %v2466_v3 }
 0x1d5   :  { %v2579_v9 = vadd.f32 %v2578_v30, %v2577_v55  ;;  %v2584_v12 = vadd.f32 %v2319_v5, %v2318_v4  ;;  %v3622_v13 = vpop.f32.mrb[68].mxu0  ;;  %v3770_v21 = vpop.f32.mrb[68].mxu1  ;;  %v2814_v3 = vpack.c.bf16 %v2806_v44, %v2806_v44 }
 0x1d6   :  { %v1503_v16 = vpop.f32.mrb[69].mxu0  ;;  %v2095_v31 = vpop.f32.mrb[69].mxu1  ;;  %v1512_v32 = vadd.f32 %v4502_v22, %v3622_v13  ;;  %v2752_v35 = vadd.f32 %v2751_v20, %v2467_v14  ;;  %v2104_v49 = vadd.f32 %v4502_v22, %v3770_v21 }
 0x1d7   :  { %v2580_v23 = vrot.slane %v2579_v9, 2  ;;  %v2585_v26 = vadd.f32 %v2584_v12, %v2320_v10  ;;  %v1504_v27 = vadd.f32 %v4502_v22, %v1503_v16  ;;  %v3623_v28 = vpop.f32.mrb[70].mxu0  ;;  %v2096_v36 = vadd.f32 %v4502_v22, %v2095_v31  ;;  %v3771_v37 = vpop.f32.mrb[70].mxu1 }
 0x1d8   :  { %v1506_v34 = vpop.f32.mrb[71].mxu0  ;;  %v2098_v43 = vpop.f32.mrb[71].mxu1  ;;  %v2753_v48 = vadd.f32 %v2752_v35, %v2468_v18  ;;  %v1515_v45 = vadd.f32 %v4502_v22, %v3623_v28  ;;  %v2107_v56 = vadd.f32 %v4502_v22, %v3771_v37  ;;  %v2324_v62 = vmax.f32 %v1512_v32, 0.0 }
 0x1d9   :  { %v2581_v29 = vadd.f32 %v2580_v23, %v2579_v9  ;;  %v2322_v38 = vmax.f32 %v1504_v27, 0.0  ;;  %v2586_v40 = vadd.f32 %v2585_v26, %v2321_v25  ;;  %v1507_v42 = vadd.f32 %v4502_v22, %v1506_v34 }
 0x1da   :  { %v2470_v50 = vmax.f32 %v2096_v36, 0.0  ;;  %v2754_v55 = vadd.f32 %v2753_v48, %v2469_v53  ;;  %v2099_v58 = vadd.f32 %v4502_v22, %v2098_v43  ;;  %v2472_v4 = vmax.f32 %v2104_v49, 0.0 }
 0x1db   :  { %v2582_v51 = vrot.slane %v2581_v29, 1  ;;  %v2587_v52 = vadd.f32 %v2586_v40, %v2322_v38  ;;  %v2323_v54 = vmax.f32 %v1507_v42, 0.0  ;;  %v2325_v9 = vmax.f32 %v1515_v45, 0.0 }
 0x1dc   :  { %v2755_v5 = vadd.f32 %v2754_v55, %v2470_v50  ;;  %v2471_v6 = vmax.f32 %v2099_v58, 0.0  ;;  %v2473_v18 = vmax.f32 %v2107_v56, 0.0  ;;  %v2853_v32 = vunpack.c.l.b16 %v2814_v3 }
 0x1dd   :  { %v2583_v60 = vadd.f32 %v2582_v51, %v2581_v29  ;;  %v2588_v0 = vadd.f32 %v2587_v52, %v2323_v54  ;;  %v3626_v1 = vpop.f32.mrb[72].mxu0  ;;  %v3774_v7 = vpop.f32.mrb[72].mxu1  ;;  %v4035_v51 = vld [vmem:[#allocation7 + $0x28] sm:$0xff]  }
 0x1de   :  { %v1519_v30 = vpop.f32.mrb[73].mxu0  ;;  %v2111_v14 = vpop.f32.mrb[73].mxu1  ;;  %v1528_v15 = vadd.f32 %v4502_v22, %v3626_v1  ;;  %v2756_v20 = vadd.f32 %v2755_v5, %v2471_v6  ;;  %v2120_v53 = vadd.f32 %v4502_v22, %v3774_v7  ;;  %3819 = vmatpush3.bf16.msra.mxu1 %v4035_v51 }
 0x1df   :  { %v2807_v8 = vmul.f32 0.00390625, %v2583_v60  ;;  %v2589_v10 = vadd.f32 %v2588_v0, %v2324_v62  ;;  %v1520_v12 = vadd.f32 %v4502_v22, %v1519_v30  ;;  %v3627_v13 = vpop.f32.mrb[74].mxu0  ;;  %v2112_v21 = vadd.f32 %v4502_v22, %v2111_v14  ;;  %v3775_v23 = vpop.f32.mrb[74].mxu1  ;;  %3820 = vmatprep.subr.bf16.mxu1 %v4203_v59 }
 0x1e0   :  { %v1522_v16 = vpop.f32.mrb[75].mxu0  ;;  %v2114_v31 = vpop.f32.mrb[75].mxu1  ;;  %v2757_v34 = vadd.f32 %v2756_v20, %v2472_v4  ;;  %v1531_v29 = vadd.f32 %v4502_v22, %v3627_v13  ;;  %v2123_v42 = vadd.f32 %v4502_v22, %v3775_v23  ;;  %v2328_v48 = vmax.f32 %v1528_v15, 0.0 }
 0x1e1   :  { %v2815_v25 = vpack.c.bf16 %v2807_v8, %v2807_v8  ;;  %v2326_v26 = vmax.f32 %v1520_v12, 0.0  ;;  %v2590_v27 = vadd.f32 %v2589_v10, %v2325_v9  ;;  %v1523_v28 = vadd.f32 %v4502_v22, %v1522_v16 }
 0x1e2   :  { %v2474_v35 = vmax.f32 %v2112_v21, 0.0  ;;  %v2758_v40 = vadd.f32 %v2757_v34, %v2473_v18  ;;  %v2115_v43 = vadd.f32 %v4502_v22, %v2114_v31  ;;  %v2476_v45 = vmax.f32 %v2120_v53, 0.0 }
 0x1e3   :  { %v2854_v36 = vunpack.c.l.b16 %v2815_v25  ;;  %v2591_v37 = vadd.f32 %v2590_v27, %v2326_v26  ;;  %v2327_v38 = vmax.f32 %v1523_v28, 0.0  ;;  %v2329_v58 = vmax.f32 %v1531_v29, 0.0 }
 0x1e4   :  { %v2759_v54 = vadd.f32 %v2758_v40, %v2474_v35  ;;  %v2475_v55 = vmax.f32 %v2115_v43, 0.0  ;;  %v2477_v4 = vmax.f32 %v2123_v42, 0.0 }
 0x1e5   :  { %v4532_v44 = vsel %vm2861_vm0, %v2854_v36, %v2853_v32  ;;  %v2592_v49 = vadd.f32 %v2591_v37, %v2327_v38  ;;  %v3630_v50 = vpop.f32.mrb[76].mxu0  ;;  %v3778_v56 = vpop.f32.mrb[76].mxu1 }
 0x1e6   :  { %v1535_v52 = vpop.f32.mrb[77].mxu0  ;;  %v2127_v1 = vpop.f32.mrb[77].mxu1  ;;  %v1544_v3 = vadd.f32 %v4502_v22, %v3630_v50  ;;  %v2760_v5 = vadd.f32 %v2759_v54, %v2475_v55  ;;  %v2136_v12 = vadd.f32 %v4502_v22, %v3778_v56 }
 0x1e7   :  { %v2593_v60 = vadd.f32 %v2592_v49, %v2328_v48  ;;  %v1536_v62 = vadd.f32 %v4502_v22, %v1535_v52  ;;  %v3631_v0 = vpop.f32.mrb[78].mxu0  ;;  %v2128_v6 = vadd.f32 %v4502_v22, %v2127_v1  ;;  %v3779_v7 = vpop.f32.mrb[78].mxu1 }
 0x1e8   :  { %v1538_v30 = vpop.f32.mrb[79].mxu0  ;;  %v2130_v13 = vpop.f32.mrb[79].mxu1  ;;  %v1547_v14 = vadd.f32 %v4502_v22, %v3631_v0  ;;  %v2761_v15 = vadd.f32 %v2760_v5, %v2476_v45  ;;  %v2139_v21 = vadd.f32 %v4502_v22, %v3779_v7  ;;  %v2332_v26 = vmax.f32 %v1544_v3, 0.0 }
 0x1e9   :  { %v2330_v8 = vmax.f32 %v1536_v62, 0.0  ;;  %v2594_v9 = vadd.f32 %v2593_v60, %v2329_v58  ;;  %v1539_v10 = vadd.f32 %v4502_v22, %v1538_v30  ;;  %v2478_v16 = vmax.f32 %v2128_v6, 0.0 }
 0x1ea   :  { %v2131_v23 = vadd.f32 %v4502_v22, %v2130_v13  ;;  %v4543_v25 = vadd.f32 %v2761_v15, %v2477_v4  ;;  %v2480_v31 = vmax.f32 %v2136_v12, 0.0  ;;  %v2333_v34 = vmax.f32 %v1547_v14, 0.0 }
 0x1eb   :  { %v2595_v18 = vadd.f32 %v2594_v9, %v2330_v8  ;;  %v2331_v20 = vmax.f32 %v1539_v10, 0.0  ;;  %v2481_v38 = vmax.f32 %v2139_v21, 0.0 }
 0x1ec   :  { %v2479_v32 = vmax.f32 %v2131_v23, 0.0 }
 0x1ed   :  { %v2596_v27 = vadd.f32 %v2595_v18, %v2331_v20  ;;  %v3634_v28 = vpop.f32.mrb[80].mxu0  ;;  %v3782_v35 = vpop.f32.mrb[80].mxu1 }
 0x1ee   :  { %v1551_v53 = vpop.f32.mrb[81].mxu0  ;;  %v2769_v40 = vadd.f32 %v2479_v32, %v2478_v16  ;;  %v2143_v42 = vpop.f32.mrb[81].mxu1  ;;  %v1560_v43 = vadd.f32 %v4502_v22, %v3634_v28  ;;  %v2152_v56 = vadd.f32 %v4502_v22, %v3782_v35 }
 0x1ef   :  { %v2597_v36 = vadd.f32 %v2596_v27, %v2332_v26  ;;  %v1552_v37 = vadd.f32 %v4502_v22, %v1551_v53  ;;  %v3635_v29 = vpop.f32.mrb[82].mxu0  ;;  %v2144_v49 = vadd.f32 %v4502_v22, %v2143_v42  ;;  %v3783_v50 = vpop.f32.mrb[82].mxu1 }
 0x1f0   :  { %v1554_v48 = vpop.f32.mrb[83].mxu0  ;;  %v2770_v54 = vadd.f32 %v2769_v40, %v2480_v31  ;;  %v2146_v55 = vpop.f32.mrb[83].mxu1  ;;  %v1563_v62 = vadd.f32 %v4502_v22, %v3635_v29  ;;  %v2155_v3 = vadd.f32 %v4502_v22, %v3783_v50  ;;  %v2336_v4 = vmax.f32 %v1560_v43, 0.0 }
 0x1f1   :  { %v2334_v51 = vmax.f32 %v1552_v37, 0.0  ;;  %v2598_v52 = vadd.f32 %v2597_v36, %v2333_v34  ;;  %v1555_v45 = vadd.f32 %v4502_v22, %v1554_v48  ;;  %v2482_v58 = vmax.f32 %v2144_v49, 0.0 }
 0x1f2   :  { %v2771_v1 = vadd.f32 %v2770_v54, %v2481_v38  ;;  %v2147_v30 = vadd.f32 %v4502_v22, %v2146_v55  ;;  %v2484_v9 = vmax.f32 %v2152_v56, 0.0  ;;  %v2337_v13 = vmax.f32 %v1563_v62, 0.0 }
 0x1f3   :  { %v2599_v60 = vadd.f32 %v2598_v52, %v2334_v51  ;;  %v2335_v0 = vmax.f32 %v1555_v45, 0.0  ;;  %v2485_v21 = vmax.f32 %v2155_v3, 0.0 }
 0x1f4   :  { %v2772_v7 = vadd.f32 %v2771_v1, %v2482_v58  ;;  %v2483_v10 = vmax.f32 %v2147_v30, 0.0 }
 0x1f5   :  { %v2600_v5 = vadd.f32 %v2599_v60, %v2335_v0  ;;  %v3638_v6 = vpop.f32.mrb[84].mxu0  ;;  %v3786_v12 = vpop.f32.mrb[84].mxu1 }
 0x1f6   :  { %v1567_v8 = vpop.f32.mrb[85].mxu0  ;;  %v2159_v18 = vpop.f32.mrb[85].mxu1  ;;  %v2773_v23 = vadd.f32 %v2772_v7, %v2483_v10  ;;  %v1576_v27 = vadd.f32 %v4502_v22, %v3638_v6  ;;  %v2168_v35 = vadd.f32 %v4502_v22, %v3786_v12 }
 0x1f7   :  { %v2601_v14 = vadd.f32 %v2600_v5, %v2336_v4  ;;  %v1568_v15 = vadd.f32 %v4502_v22, %v1567_v8  ;;  %v3639_v16 = vpop.f32.mrb[86].mxu0  ;;  %v3787_v26 = vpop.f32.mrb[86].mxu1  ;;  %v2160_v36 = vadd.f32 %v4502_v22, %v2159_v18 }
 0x1f8   :  { %v1570_v20 = vpop.f32.mrb[87].mxu0  ;;  %v2162_v34 = vpop.f32.mrb[87].mxu1  ;;  %v2774_v53 = vadd.f32 %v2773_v23, %v2484_v9  ;;  %v1579_v29 = vadd.f32 %v4502_v22, %v3639_v16  ;;  %v2171_v48 = vadd.f32 %v4502_v22, %v3787_v26  ;;  %v2340_v49 = vmax.f32 %v1576_v27, 0.0 }
 0x1f9   :  { %v2338_v28 = vmax.f32 %v1568_v15, 0.0  ;;  %v2602_v31 = vadd.f32 %v2601_v14, %v2337_v13  ;;  %v1571_v32 = vadd.f32 %v4502_v22, %v1570_v20  ;;  %v2163_v40 = vadd.f32 %v4502_v22, %v2162_v34 }
 0x1fa   :  { %v2486_v42 = vmax.f32 %v2160_v36, 0.0  ;;  %v2775_v43 = vadd.f32 %v2774_v53, %v2485_v21  ;;  %v2488_v54 = vmax.f32 %v2168_v35, 0.0  ;;  %v2341_v58 = vmax.f32 %v1579_v29, 0.0 }
 0x1fb   :  { %v2603_v37 = vadd.f32 %v2602_v31, %v2338_v28  ;;  %v2339_v38 = vmax.f32 %v1571_v32, 0.0  ;;  %v2487_v52 = vmax.f32 %v2163_v40, 0.0  ;;  %v2489_v30 = vmax.f32 %v2171_v48, 0.0 }
 0x1fc   :  { %v2776_v55 = vadd.f32 %v2775_v43, %v2486_v42 }
 0x1fd   :  { %v2604_v50 = vadd.f32 %v2603_v37, %v2339_v38  ;;  %v3642_v51 = vpop.f32.mrb[88].mxu0  ;;  %v3790_v56 = vpop.f32.mrb[88].mxu1 }
 0x1fe   :  { %v1583_v45 = vpop.f32.mrb[89].mxu0  ;;  %v2175_v1 = vpop.f32.mrb[89].mxu1  ;;  %v2777_v4 = vadd.f32 %v2776_v55, %v2487_v52  ;;  %v1592_v7 = vadd.f32 %v4502_v22, %v3642_v51  ;;  %v2184_v14 = vadd.f32 %v4502_v22, %v3790_v56 }
 0x1ff   :  { %v2605_v60 = vadd.f32 %v2604_v50, %v2340_v49  ;;  %v1584_v62 = vadd.f32 %v4502_v22, %v1583_v45  ;;  %v3643_v0 = vpop.f32.mrb[90].mxu0  ;;  %v2176_v5 = vadd.f32 %v4502_v22, %v2175_v1  ;;  %v3791_v6 = vpop.f32.mrb[90].mxu1 }
 0x200   :  { %v1586_v3 = vpop.f32.mrb[91].mxu0  ;;  %v2178_v12 = vpop.f32.mrb[91].mxu1  ;;  %v2778_v13 = vadd.f32 %v2777_v4, %v2488_v54  ;;  %v1595_v18 = vadd.f32 %v4502_v22, %v3643_v0  ;;  %v2187_v26 = vadd.f32 %v4502_v22, %v3791_v6  ;;  %v2344_v27 = vmax.f32 %v1592_v7, 0.0 }
 0x201   :  { %v2342_v8 = vmax.f32 %v1584_v62, 0.0  ;;  %v2606_v9 = vadd.f32 %v2605_v60, %v2341_v58  ;;  %v1587_v10 = vadd.f32 %v4502_v22, %v1586_v3  ;;  %v2490_v15 = vmax.f32 %v2176_v5, 0.0 }
 0x202   :  { %v2179_v21 = vadd.f32 %v4502_v22, %v2178_v12  ;;  %v2779_v23 = vadd.f32 %v2778_v13, %v2489_v30  ;;  %v2492_v53 = vmax.f32 %v2184_v14, 0.0  ;;  %v2345_v37 = vmax.f32 %v1595_v18, 0.0 }
 0x203   :  { %v2607_v16 = vadd.f32 %v2606_v9, %v2342_v8  ;;  %v2343_v20 = vmax.f32 %v1587_v10, 0.0  ;;  %v2493_v48 = vmax.f32 %v2187_v26, 0.0 }
 0x204   :  { %v2491_v32 = vmax.f32 %v2179_v21, 0.0  ;;  %v2780_v35 = vadd.f32 %v2779_v23, %v2490_v15  ;;  %v4036_v23 = vld [vmem:[#allocation7 + $0x30] sm:$0xff]  }
 0x205   :  { %v2608_v28 = vadd.f32 %v2607_v16, %v2343_v20  ;;  %v3646_v31 = vpop.f32.mrb[92].mxu0  ;;  %v3794_v36 = vpop.f32.mrb[92].mxu1  ;;  %3821 = vmatpush3.bf16.msra.mxu1 %v4036_v23 }
 0x206   :  { %v1599_v34 = vpop.f32.mrb[93].mxu0  ;;  %v2191_v42 = vpop.f32.mrb[93].mxu1  ;;  %v2781_v49 = vadd.f32 %v2780_v35, %v2491_v32  ;;  %v1608_v52 = vadd.f32 %v4502_v22, %v3646_v31  ;;  %v2200_v60 = vadd.f32 %v4502_v22, %v3794_v36  ;;  %3822 = vmatprep.subr.bf16.mxu1 %v4203_v59 }
 0x207   :  { %v2609_v29 = vadd.f32 %v2608_v28, %v2344_v27  ;;  %v1600_v38 = vadd.f32 %v4502_v22, %v1599_v34  ;;  %v3647_v40 = vpop.f32.mrb[94].mxu0  ;;  %v2192_v50 = vadd.f32 %v4502_v22, %v2191_v42  ;;  %v3795_v51 = vpop.f32.mrb[94].mxu1 }
 0x208   :  { %v1602_v43 = vpop.f32.mrb[95].mxu0  ;;  %v2194_v56 = vpop.f32.mrb[95].mxu1  ;;  %v2782_v58 = vadd.f32 %v2781_v49, %v2492_v53  ;;  %v1611_v1 = vadd.f32 %v4502_v22, %v3647_v40  ;;  %v2203_v5 = vadd.f32 %v4502_v22, %v3795_v51  ;;  %v2348_v6 = vmax.f32 %v1608_v52, 0.0 }
 0x209   :  { %v2346_v45 = vmax.f32 %v1600_v38, 0.0  ;;  %v2610_v54 = vadd.f32 %v2609_v29, %v2345_v37  ;;  %v1603_v55 = vadd.f32 %v4502_v22, %v1602_v43  ;;  %v2494_v62 = vmax.f32 %v2192_v50, 0.0  ;;  %v4037_v37 = vld [vmem:[#allocation7 + $0x38] sm:$0xff]  }
 0x20a   :  { %v2195_v30 = vadd.f32 %v4502_v22, %v2194_v56  ;;  %v2783_v4 = vadd.f32 %v2782_v58, %v2493_v48  ;;  %v2496_v12 = vmax.f32 %v2200_v60, 0.0  ;;  %v2349_v15 = vmax.f32 %v1611_v1, 0.0  ;;  %3823 = vmatpush3.bf16.msra.mxu1 %v4037_v37 }
 0x20b   :  { %v2611_v0 = vadd.f32 %v2610_v54, %v2346_v45  ;;  %v2347_v3 = vmax.f32 %v1603_v55, 0.0  ;;  %v2497_v27 = vmax.f32 %v2203_v5, 0.0  ;;  %3828 = vmatprep.subr.bf16.mxu1 %v4203_v59 }
 0x20c   :  { %v2495_v9 = vmax.f32 %v2195_v30, 0.0  ;;  %v2784_v13 = vadd.f32 %v2783_v4, %v2494_v62 }
 0x20d   :  { %v2612_v7 = vadd.f32 %v2611_v0, %v2347_v3  ;;  %v3650_v8 = vpop.f32.mrb[96].mxu0  ;;  %v3798_v14 = vpop.f32.mrb[96].mxu1 }
 0x20e   :  { %v1615_v10 = vpop.f32.mrb[97].mxu0  ;;  %v2207_v21 = vpop.f32.mrb[97].mxu1  ;;  %v2785_v28 = vadd.f32 %v2784_v13, %v2495_v9  ;;  %v1624_v53 = vadd.f32 %v4502_v22, %v3650_v8  ;;  %v2216_v40 = vadd.f32 %v4502_v22, %v3798_v14 }
 0x20f   :  { %v2613_v16 = vadd.f32 %v2612_v7, %v2348_v6  ;;  %v1616_v18 = vadd.f32 %v4502_v22, %v1615_v10  ;;  %v3651_v20 = vpop.f32.mrb[98].mxu0  ;;  %v2208_v31 = vadd.f32 %v4502_v22, %v2207_v21  ;;  %v3799_v32 = vpop.f32.mrb[98].mxu1 }
 0x210   :  { %v1618_v26 = vpop.f32.mrb[99].mxu0  ;;  %v2210_v36 = vpop.f32.mrb[99].mxu1  ;;  %v1627_v29 = vadd.f32 %v4502_v22, %v3651_v20  ;;  %v2786_v38 = vadd.f32 %v2785_v28, %v2496_v12  ;;  %v2219_v52 = vadd.f32 %v4502_v22, %v3799_v32  ;;  %v2352_v54 = vmax.f32 %v1624_v53, 0.0 }
 0x211   :  { %v2614_v34 = vadd.f32 %v2613_v16, %v2349_v15  ;;  %v1619_v35 = vadd.f32 %v4502_v22, %v1618_v26  ;;  %v2498_v42 = vmax.f32 %v2208_v31, 0.0  ;;  %v2350_v48 = vmax.f32 %v1616_v18, 0.0 }
 0x212   :  { %v2211_v50 = vadd.f32 %v4502_v22, %v2210_v36  ;;  %v2787_v51 = vadd.f32 %v2786_v38, %v2497_v27  ;;  %v2500_v62 = vmax.f32 %v2216_v40, 0.0  ;;  %v2353_v30 = vmax.f32 %v1627_v29, 0.0 }
 0x213   :  { %v2615_v43 = vrot.slane %v2614_v34, 4  ;;  %v2351_v49 = vmax.f32 %v1619_v35, 0.0  ;;  %v2501_v10 = vmax.f32 %v2219_v52, 0.0 }
 0x214   :  { %v2499_v58 = vmax.f32 %v2211_v50, 0.0  ;;  %v2788_v0 = vadd.f32 %v2787_v51, %v2498_v42 }
 0x215   :  { %v2616_v45 = vadd.f32 %v2615_v43, %v2614_v34  ;;  %v2621_v55 = vadd.f32 %v2351_v49, %v2350_v48  ;;  %v3654_v56 = vpop.f32.mrb[100].mxu0  ;;  %v3802_v1 = vpop.f32.mrb[100].mxu1 }
 0x216   :  { %v1631_v60 = vpop.f32.mrb[101].mxu0  ;;  %v2223_v7 = vpop.f32.mrb[101].mxu1  ;;  %v1640_v8 = vadd.f32 %v4502_v22, %v3654_v56  ;;  %v2789_v12 = vadd.f32 %v2788_v0, %v2499_v58  ;;  %v2232_v26 = vadd.f32 %v4502_v22, %v3802_v1 }
 0x217   :  { %v2617_v3 = vrot.slane %v2616_v45, 2  ;;  %v2622_v4 = vadd.f32 %v2621_v55, %v2352_v54  ;;  %v1632_v5 = vadd.f32 %v4502_v22, %v1631_v60  ;;  %v3655_v6 = vpop.f32.mrb[102].mxu0  ;;  %v2224_v13 = vadd.f32 %v4502_v22, %v2223_v7  ;;  %v3803_v14 = vpop.f32.mrb[102].mxu1 }
 0x218   :  { %v1634_v9 = vpop.f32.mrb[103].mxu0  ;;  %v2226_v21 = vpop.f32.mrb[103].mxu1  ;;  %v2790_v23 = vadd.f32 %v2789_v12, %v2500_v62  ;;  %v1643_v32 = vadd.f32 %v4502_v22, %v3655_v6  ;;  %v2235_v35 = vadd.f32 %v4502_v22, %v3803_v14  ;;  %v2356_v29 = vmax.f32 %v1640_v8, 0.0 }
 0x219   :  { %v2618_v15 = vadd.f32 %v2617_v3, %v2616_v45  ;;  %v2354_v16 = vmax.f32 %v1632_v5, 0.0  ;;  %v2623_v18 = vadd.f32 %v2622_v4, %v2353_v30  ;;  %v1635_v20 = vadd.f32 %v4502_v22, %v1634_v9 }
 0x21a   :  { %v2502_v27 = vmax.f32 %v2224_v13, 0.0  ;;  %v2791_v53 = vadd.f32 %v2790_v23, %v2501_v10  ;;  %v2227_v36 = vadd.f32 %v4502_v22, %v2226_v21  ;;  %v2504_v43 = vmax.f32 %v2232_v26, 0.0 }
 0x21b   :  { %v2619_v28 = vrot.slane %v2618_v15, 1  ;;  %v2624_v31 = vadd.f32 %v2623_v18, %v2354_v16  ;;  %v2355_v34 = vmax.f32 %v1635_v20, 0.0  ;;  %v2357_v52 = vmax.f32 %v1643_v32, 0.0 }
 0x21c   :  { %v2792_v48 = vadd.f32 %v2791_v53, %v2502_v27  ;;  %v2503_v49 = vmax.f32 %v2227_v36, 0.0  ;;  %v2505_v62 = vmax.f32 %v2235_v35, 0.0 }
 0x21d   :  { %v2620_v37 = vadd.f32 %v2619_v28, %v2618_v15  ;;  %v2625_v38 = vadd.f32 %v2624_v31, %v2355_v34  ;;  %v3658_v40 = vpop.f32.mrb[104].mxu0  ;;  %v3806_v50 = vpop.f32.mrb[104].mxu1 }
 0x21e   :  { %v1647_v42 = vpop.f32.mrb[105].mxu0  ;;  %v2239_v56 = vpop.f32.mrb[105].mxu1  ;;  %v1656_v58 = vadd.f32 %v4502_v22, %v3658_v40  ;;  %v2793_v0 = vadd.f32 %v2792_v48, %v2503_v49  ;;  %v2248_v9 = vadd.f32 %v4502_v22, %v3806_v50 }
 0x21f   :  { %v2808_v51 = vmul.f32 0.00390625, %v2620_v37  ;;  %v2626_v45 = vadd.f32 %v2625_v38, %v2356_v29  ;;  %v1648_v54 = vadd.f32 %v4502_v22, %v1647_v42  ;;  %v3659_v55 = vpop.f32.mrb[106].mxu0  ;;  %v2240_v1 = vadd.f32 %v4502_v22, %v2239_v56  ;;  %v3807_v3 = vpop.f32.mrb[106].mxu1 }
 0x220   :  { %v1650_v60 = vpop.f32.mrb[107].mxu0  ;;  %v2242_v7 = vpop.f32.mrb[107].mxu1  ;;  %v2794_v8 = vadd.f32 %v2793_v0, %v2504_v43  ;;  %v1659_v14 = vadd.f32 %v4502_v22, %v3659_v55  ;;  %v2251_v18 = vadd.f32 %v4502_v22, %v3807_v3  ;;  %v2360_v23 = vmax.f32 %v1656_v58, 0.0 }
 0x221   :  { %v2816_v30 = vpack.c.bf16 %v2808_v51, %v2808_v51  ;;  %v2358_v4 = vmax.f32 %v1648_v54, 0.0  ;;  %v2627_v5 = vadd.f32 %v2626_v45, %v2357_v52  ;;  %v1651_v6 = vadd.f32 %v4502_v22, %v1650_v60 }
 0x222   :  { %v2506_v10 = vmax.f32 %v2240_v1, 0.0  ;;  %v2795_v16 = vadd.f32 %v2794_v8, %v2505_v62  ;;  %v2243_v20 = vadd.f32 %v4502_v22, %v2242_v7  ;;  %v2508_v31 = vmax.f32 %v2248_v9, 0.0 }
 0x223   :  { %v2855_v12 = vunpack.c.l.b16 %v2816_v30  ;;  %v2628_v13 = vadd.f32 %v2627_v5, %v2358_v4  ;;  %v2359_v15 = vmax.f32 %v1651_v6, 0.0  ;;  %v2361_v53 = vmax.f32 %v1659_v14, 0.0 }
 0x224   :  { %v2796_v32 = vadd.f32 %v2795_v16, %v2506_v10  ;;  %v2507_v34 = vmax.f32 %v2243_v20, 0.0  ;;  %v2509_v38 = vmax.f32 %v2251_v18, 0.0 }
 0x225   :  { %v4606_v21 = vsel %vm2863_vm2, %v2855_v12, %v4532_v44  ;;  %v2629_v26 = vadd.f32 %v2628_v13, %v2359_v15  ;;  %v3662_v27 = vpop.f32.mrb[108].mxu0 }
 0x226   :  { %v1663_v28 = vpop.f32.mrb[109].mxu0  ;;  %v2797_v40 = vadd.f32 %v2796_v32, %v2507_v34  ;;  %v1672_v42 = vadd.f32 %v4502_v22, %v3662_v27 }
 0x227   :  { %v2630_v35 = vadd.f32 %v2629_v26, %v2360_v23  ;;  %v1664_v36 = vadd.f32 %v4502_v22, %v1663_v28  ;;  %v3663_v37 = vpop.f32.mrb[110].mxu0 }
 0x228   :  { %v1666_v29 = vpop.f32.mrb[111].mxu0  ;;  %v2798_v49 = vadd.f32 %v2797_v40, %v2508_v31  ;;  %v1675_v51 = vadd.f32 %v4502_v22, %v3663_v37  ;;  %v2364_v54 = vmax.f32 %v1672_v42, 0.0 }
 0x229   :  { %v2362_v43 = vmax.f32 %v1664_v36, 0.0  ;;  %v2631_v44 = vadd.f32 %v2630_v35, %v2361_v53  ;;  %v1667_v48 = vadd.f32 %v4502_v22, %v1666_v29 }
 0x22a   :  { %v4612_v45 = vadd.f32 %v2798_v49, %v2509_v38  ;;  %v2365_v60 = vmax.f32 %v1675_v51, 0.0 }
 0x22b   :  { %v2632_v50 = vadd.f32 %v2631_v44, %v2362_v43  ;;  %v2363_v52 = vmax.f32 %v1667_v48, 0.0 }
 0x22d   :  { %v2633_v55 = vadd.f32 %v2632_v50, %v2363_v52  ;;  %v3666_v56 = vpop.f32.mrb[112].mxu0 }
 0x22e   :  { %v1679_v58 = vpop.f32.mrb[113].mxu0  ;;  %v1688_v30 = vadd.f32 %v4502_v22, %v3666_v56 }
 0x22f   :  { %v2634_v62 = vadd.f32 %v2633_v55, %v2364_v54  ;;  %v1680_v0 = vadd.f32 %v4502_v22, %v1679_v58  ;;  %v3667_v1 = vpop.f32.mrb[114].mxu0 }
 0x230   :  { %v1682_v3 = vpop.f32.mrb[115].mxu0  ;;  %v1691_v8 = vadd.f32 %v4502_v22, %v3667_v1  ;;  %v2368_v10 = vmax.f32 %v1688_v30, 0.0 }
 0x231   :  { %v2366_v4 = vmax.f32 %v1680_v0, 0.0  ;;  %v2635_v5 = vadd.f32 %v2634_v62, %v2365_v60  ;;  %v1683_v6 = vadd.f32 %v4502_v22, %v1682_v3 }
 0x232   :  { %v2369_v15 = vmax.f32 %v1691_v8, 0.0 }
 0x233   :  { %v2636_v7 = vadd.f32 %v2635_v5, %v2366_v4  ;;  %v2367_v9 = vmax.f32 %v1683_v6, 0.0 }
 0x235   :  { %v2637_v12 = vadd.f32 %v2636_v7, %v2367_v9  ;;  %v3670_v13 = vpop.f32.mrb[116].mxu0 }
 0x236   :  { %v1695_v14 = vpop.f32.mrb[117].mxu0  ;;  %v1704_v26 = vadd.f32 %v4502_v22, %v3670_v13 }
 0x237   :  { %v2638_v16 = vadd.f32 %v2637_v12, %v2368_v10  ;;  %v1696_v18 = vadd.f32 %v4502_v22, %v1695_v14  ;;  %v3671_v20 = vpop.f32.mrb[118].mxu0 }
 0x238   :  { %v1698_v23 = vpop.f32.mrb[119].mxu0  ;;  %v1707_v34 = vadd.f32 %v4502_v22, %v3671_v20  ;;  %v2372_v35 = vmax.f32 %v1704_v26, 0.0 }
 0x239   :  { %v2370_v27 = vmax.f32 %v1696_v18, 0.0  ;;  %v2639_v28 = vadd.f32 %v2638_v16, %v2369_v15  ;;  %v1699_v31 = vadd.f32 %v4502_v22, %v1698_v23 }
 0x23a   :  { %v2373_v38 = vmax.f32 %v1707_v34, 0.0 }
 0x23b   :  { %v2640_v32 = vadd.f32 %v2639_v28, %v2370_v27  ;;  %v2371_v53 = vmax.f32 %v1699_v31, 0.0 }
 0x23d   :  { %v2641_v36 = vadd.f32 %v2640_v32, %v2371_v53  ;;  %v3674_v37 = vpop.f32.mrb[120].mxu0 }
 0x23e   :  { %v1711_v29 = vpop.f32.mrb[121].mxu0  ;;  %v1720_v48 = vadd.f32 %v4502_v22, %v3674_v37 }
 0x23f   :  { %v2642_v40 = vadd.f32 %v2641_v36, %v2372_v35  ;;  %v1712_v42 = vadd.f32 %v4502_v22, %v1711_v29  ;;  %v3675_v43 = vpop.f32.mrb[122].mxu0 }
 0x240   :  { %v1714_v44 = vpop.f32.mrb[123].mxu0  ;;  %v1723_v54 = vadd.f32 %v4502_v22, %v3675_v43  ;;  %v2376_v56 = vmax.f32 %v1720_v48, 0.0 }
 0x241   :  { %v2374_v49 = vmax.f32 %v1712_v42, 0.0  ;;  %v2643_v50 = vadd.f32 %v2642_v40, %v2373_v38  ;;  %v1715_v51 = vadd.f32 %v4502_v22, %v1714_v44 }
 0x242   :  { %v2377_v0 = vmax.f32 %v1723_v54, 0.0 }
 0x243   :  { %v2644_v52 = vadd.f32 %v2643_v50, %v2374_v49  ;;  %v2375_v55 = vmax.f32 %v1715_v51, 0.0 }
 0x245   :  { %v2645_v58 = vadd.f32 %v2644_v52, %v2375_v55  ;;  %v3678_v60 = vpop.f32.mrb[124].mxu0 }
 0x246   :  { %v1727_v62 = vpop.f32.mrb[125].mxu0  ;;  %v1736_v5 = vadd.f32 %v4502_v22, %v3678_v60 }
 0x247   :  { %v2646_v1 = vadd.f32 %v2645_v58, %v2376_v56  ;;  %v1728_v3 = vadd.f32 %v4502_v22, %v1727_v62  ;;  %v3679_v30 = vpop.f32.mrb[126].mxu0 }
 0x248   :  { %v1730_v4 = vpop.f32.mrb[127].mxu0  ;;  %v1739_v10 = vadd.f32 %v4502_v22, %v3679_v30  ;;  %v2380_v13 = vmax.f32 %v1736_v5, 0.0 }
 0x249   :  { %v2378_v6 = vmax.f32 %v1728_v3, 0.0  ;;  %v2647_v7 = vadd.f32 %v2646_v1, %v2377_v0  ;;  %v1731_v8 = vadd.f32 %v4502_v22, %v1730_v4  ;;  %v4640_v0 = vld [vmem:[%s4731_s2] ss:$0 sm:$0xff] }
 0x24a   :  { %v2381_v18 = vmax.f32 %v1739_v10, 0.0 }
 0x24b   :  { %v2648_v9 = vadd.f32 %v2647_v7, %v2378_v6  ;;  %v2379_v12 = vmax.f32 %v1731_v8, 0.0 }
 0x24d   :  { %v2649_v14 = vadd.f32 %v2648_v9, %v2379_v12  ;;  %v3682_v15 = vpop.f32.mrb[128].mxu0 }
 0x24e   :  { %v1743_v16 = vpop.f32.mrb[129].mxu0  ;;  %v1752_v31 = vadd.f32 %v4502_v22, %v3682_v15 }
 0x24f   :  { %v2650_v20 = vadd.f32 %v2649_v14, %v2380_v13  ;;  %v1744_v23 = vadd.f32 %v4502_v22, %v1743_v16  ;;  %v3683_v26 = vpop.f32.mrb[130].mxu0 }
 0x250   :  { %v1746_v27 = vpop.f32.mrb[131].mxu0  ;;  %v1755_v35 = vadd.f32 %v4502_v22, %v3683_v26  ;;  %v2384_v29 = vmax.f32 %v1752_v31, 0.0 }
 0x251   :  { %v2651_v28 = vadd.f32 %v2650_v20, %v2381_v18  ;;  %v1747_v32 = vadd.f32 %v4502_v22, %v1746_v27  ;;  %v2382_v53 = vmax.f32 %v1744_v23, 0.0 }
 0x252   :  { %v2385_v44 = vmax.f32 %v1755_v35, 0.0 }
 0x253   :  { %v2652_v34 = vrot.slane %v2651_v28, 4  ;;  %v2383_v36 = vmax.f32 %v1747_v32, 0.0 }
 0x255   :  { %v2653_v37 = vadd.f32 %v2652_v34, %v2651_v28  ;;  %v2658_v38 = vadd.f32 %v2383_v36, %v2382_v53  ;;  %v3686_v40 = vpop.f32.mrb[132].mxu0 }
 0x256   :  { %v1759_v42 = vpop.f32.mrb[133].mxu0  ;;  %v1768_v51 = vadd.f32 %v4502_v22, %v3686_v40 }
 0x257   :  { %v2654_v43 = vrot.slane %v2653_v37, 2  ;;  %v2659_v48 = vadd.f32 %v2658_v38, %v2384_v29  ;;  %v1760_v49 = vadd.f32 %v4502_v22, %v1759_v42  ;;  %v3687_v50 = vpop.f32.mrb[134].mxu0 }
 0x258   :  { %v1762_v52 = vpop.f32.mrb[135].mxu0  ;;  %v1771_v1 = vadd.f32 %v4640_v0, %v3687_v50  ;;  %v2388_v4 = vmax.f32 %v1768_v51, 0.0 }
 0x259   :  { %v2655_v54 = vadd.f32 %v2654_v43, %v2653_v37  ;;  %v2386_v55 = vmax.f32 %v1760_v49, 0.0  ;;  %v2660_v56 = vadd.f32 %v2659_v48, %v2385_v44  ;;  %v1763_v58 = vadd.f32 %v4502_v22, %v1762_v52 }
 0x25a   :  { %v2389_v9 = vmax.f32 %v1771_v1, 0.0 }
 0x25b   :  { %v2656_v60 = vrot.slane %v2655_v54, 1  ;;  %v2661_v62 = vadd.f32 %v2660_v56, %v2386_v55  ;;  %v2387_v3 = vmax.f32 %v1763_v58, 0.0 }
 0x25d   :  { %v2657_v30 = vadd.f32 %v2656_v60, %v2655_v54  ;;  %v2662_v5 = vadd.f32 %v2661_v62, %v2387_v3  ;;  %v3690_v6 = vpop.f32.mrb[136].mxu0 }
 0x25e   :  { %v1775_v7 = vpop.f32.mrb[137].mxu0  ;;  %v1784_v13 = vadd.f32 %v4640_v0, %v3690_v6 }
 0x25f   :  { %v2809_v8 = vmul.f32 0.00390625, %v2657_v30  ;;  %v2663_v10 = vadd.f32 %v2662_v5, %v2388_v4  ;;  %v1776_v22 = vadd.f32 %v4640_v0, %v1775_v7  ;;  %v3691_v12 = vpop.f32.mrb[138].mxu0 }
 0x260   :  { %v1778_v14 = vpop.f32.mrb[139].mxu0  ;;  %v1787_v27 = vadd.f32 %v4640_v0, %v3691_v12  ;;  %v2392_v32 = vmax.f32 %v1784_v13, 0.0  ;;  %v1827_v12 = vadd.f32 %v4640_v0, %v4359_v2  ;;  %v1843_v2 = vadd.f32 %v4640_v0, %v4371_v24 }
 0x261   :  { %v2817_v15 = vpack.c.bf16 %v2809_v8, %v2809_v8  ;;  %v2390_v16 = vmax.f32 %v1776_v22, 0.0  ;;  %v2664_v18 = vadd.f32 %v2663_v10, %v2389_v9  ;;  %v1779_v20 = vadd.f32 %v4640_v0, %v1778_v14 }
 0x262   :  { %v2393_v36 = vmax.f32 %v1787_v27, 0.0  ;;  %v1824_v9 = vadd.f32 %v4640_v0, %v4353_v61  ;;  %v1840_v61 = vadd.f32 %v4640_v0, %v4365_v17  ;;  %v1856_v17 = vadd.f32 %v4640_v0, %v4377_v39 }
 0x263   :  { %v2856_v23 = vunpack.c.l.b16 %v2817_v15  ;;  %v2665_v26 = vadd.f32 %v2664_v18, %v2390_v16  ;;  %v2391_v28 = vmax.f32 %v1779_v20, 0.0  ;;  %v1832_v15 = vadd.f32 %v4640_v0, %v4350_v57 }
 0x264   :  { %v2402_v16 = vmax.f32 %v1824_v9, 0.0  ;;  %v1835_v20 = vadd.f32 %v4640_v0, %v4355_v63  ;;  %v1848_v57 = vadd.f32 %v4640_v0, %v4362_v11  ;;  %v1851_v63 = vadd.f32 %v4640_v0, %v4367_v19 }
 0x265   :  { %v4648_v31 = vsel %vm2865_vm3, %v2856_v23, %v4606_v21  ;;  %v2666_v34 = vadd.f32 %v2665_v26, %v2391_v28  ;;  %v3694_v53 = vpop.f32.mrb[140].mxu0  ;;  %v2403_v23 = vmax.f32 %v1827_v12, 0.0  ;;  %v2404_v27 = vmax.f32 %v1832_v15, 0.0 }
 0x266   :  { %v1791_v35 = vpop.f32.mrb[141].mxu0  ;;  %v1800_v42 = vadd.f32 %v4640_v0, %v3694_v53  ;;  %v2406_v53 = vmax.f32 %v1840_v61, 0.0  ;;  %v1859_v11 = vadd.f32 %v4640_v0, %v4383_v46 }
 0x267   :  { %v2667_v37 = vadd.f32 %v2666_v34, %v2392_v32  ;;  %v1792_v29 = vadd.f32 %v4640_v0, %v1791_v35  ;;  %v3695_v38 = vpop.f32.mrb[142].mxu0  ;;  %v2405_v32 = vmax.f32 %v1835_v20, 0.0 }
 0x268   :  { %v1794_v40 = vpop.f32.mrb[143].mxu0  ;;  %v1803_v21 = vadd.f32 %v4640_v0, %v3695_v38  ;;  %v2396_v51 = vmax.f32 %v1800_v42, 0.0  ;;  %v2408_v38 = vmax.f32 %v1848_v57, 0.0  ;;  %v2800_v42 = vrot.slane %v4612_v45, 4 }
 0x269   :  { %v2394_v43 = vmax.f32 %v1792_v29, 0.0  ;;  %v2668_v44 = vadd.f32 %v2667_v37, %v2393_v36  ;;  %v1795_v48 = vadd.f32 %v4640_v0, %v1794_v40  ;;  %v2407_v36 = vmax.f32 %v1843_v2, 0.0 }
 0x26a   :  { %v2397_v56 = vmax.f32 %v1803_v21, 0.0  ;;  %v2726_v29 = vrot.slane %v4464_v47, 4  ;;  %v2763_v40 = vrot.slane %v4543_v25, 4  ;;  %v2801_v39 = vadd.f32 %v2800_v42, %v4612_v45 }
 0x26b   :  { %v2669_v49 = vadd.f32 %v2668_v44, %v2394_v43  ;;  %v2395_v50 = vmax.f32 %v1795_v48, 0.0  ;;  %v2409_v43 = vmax.f32 %v1851_v63, 0.0  ;;  %v1864_v48 = vadd.f32 %v4640_v0, %v4374_v33  ;;  %v4039_v63 = vld [vmem:[#allocation8 + $0x8] sm:$0xff]  }
 0x26c   :  { %v2727_v19 = vadd.f32 %v2726_v29, %v4464_v47  ;;  %v2764_v21 = vadd.f32 %v2763_v40, %v4543_v25  ;;  %v4043_v29 = vld [vmem:[#allocation8 + $0x28] sm:$0xff]   ;;  %v3346_v40 = vld [vmem:[%s4733_s4] ss:$0 sm:$0xff] }
 0x26d   :  { %v2670_v52 = vadd.f32 %v2669_v49, %v2395_v50  ;;  %v3698_v54 = vpop.f32.mrb[144].mxu0  ;;  %v2410_v49 = vmax.f32 %v1856_v17, 0.0  ;;  %v4045_v17 = vld [vmem:[#allocation8 + $0x38] sm:$0xff]  }
 0x26e   :  { %v1807_v55 = vpop.f32.mrb[145].mxu0  ;;  %v1816_v3 = vadd.f32 %v4640_v0, %v3698_v54  ;;  %v2765_v46 = vrot.slane %v2764_v21, 2 }
 0x26f   :  { %v2671_v58 = vadd.f32 %v2670_v52, %v2396_v51  ;;  %v1808_v60 = vadd.f32 %v4640_v0, %v1807_v55  ;;  %v3699_v62 = vpop.f32.mrb[146].mxu0  ;;  %v1867_v51 = vadd.f32 %v4640_v0, %v4379_v41  ;;  %v2411_v52 = vmax.f32 %v1859_v11, 0.0 }
 0x270   :  { %v1810_v1 = vpop.f32.mrb[147].mxu0  ;;  %v1819_v7 = vadd.f32 %v4640_v0, %v3699_v62  ;;  %v2400_v10 = vmax.f32 %v1816_v3, 0.0  ;;  %v2728_v55 = vrot.slane %v2727_v19, 2  ;;  %v2766_v33 = vadd.f32 %v2765_v46, %v2764_v21  ;;  %v4047_v21 = vld [vmem:[#allocation10 + $0x8] sm:$0xff]  }
 0x271   :  { %v2398_v30 = vmax.f32 %v1808_v60, 0.0  ;;  %v2672_v4 = vadd.f32 %v2671_v58, %v2397_v56  ;;  %v1811_v5 = vadd.f32 %v4640_v0, %v1810_v1  ;;  %v2412_v56 = vmax.f32 %v1864_v48, 0.0  ;;  %v4046_v48 = vld [vmem:[#allocation10] sm:$0xff]  }
 0x272   :  { %v2401_v13 = vmax.f32 %v1819_v7, 0.0  ;;  %v2802_v60 = vrot.slane %v2801_v39, 2  ;;  %v2413_v47 = vmax.f32 %v1867_v51, 0.0  ;;  %v2729_v1 = vadd.f32 %v2728_v55, %v2727_v19  ;;  %v4050_v51 = vld [vmem:[#allocation10 + $0x20] sm:$0xff]   ;;  %v4053_v55 = vld [vmem:[#allocation10 + $0x38] sm:$0xff]  }
 0x273   :  { %v2673_v6 = vadd.f32 %v2672_v4, %v2398_v30  ;;  %v2399_v8 = vmax.f32 %v1811_v5, 0.0  ;;  %v2767_v5 = vrot.slane %v2766_v33, 1 }
 0x274   :  { %v2803_v30 = vadd.f32 %v2802_v60, %v2801_v39  ;;  %v2730_v4 = vrot.slane %v2729_v1, 1  ;;  %v4049_v39 = vld [vmem:[#allocation10 + $0x18] sm:$0xff]  }
 0x275   :  { %v2674_v22 = vadd.f32 %v2673_v6, %v2399_v8  ;;  %v2768_v0 = vadd.f32 %v2767_v5, %v2766_v33 }
 0x276   :  { %v2804_v6 = vrot.slane %v2803_v30, 1  ;;  %v2731_v41 = vadd.f32 %v2730_v4, %v2729_v1 }
 0x277   :  { %v2675_v14 = vadd.f32 %v2674_v22, %v2400_v10  ;;  %v2812_v12 = vmul.f32 0.00390625, %v2768_v0 }
 0x278   :  { %v2805_v9 = vadd.f32 %v2804_v6, %v2803_v30  ;;  %v2811_v22 = vmul.f32 0.00390625, %v2731_v41 }
 0x279   :  { %v2676_v18 = vadd.f32 %v2675_v14, %v2401_v13 }
 0x27a   :  { %v2813_v14 = vmul.f32 0.00390625, %v2805_v9 }
 0x27b   :  { %v2677_v26 = vadd.f32 %v2676_v18, %v2402_v16  ;;  %v2819_v16 = vpack.c.bf16 %v2811_v22, %v2811_v22  ;;  %v2820_v18 = vpack.c.bf16 %v2812_v12, %v2812_v12 }
 0x27d   :  { %v2678_v28 = vadd.f32 %v2677_v26, %v2403_v23  ;;  %v2821_v23 = vpack.c.bf16 %v2813_v14, %v2813_v14  ;;  %v2859_v61 = vunpack.c.l.b16 %v2820_v18 }
 0x27f   :  { %v2679_v34 = vadd.f32 %v2678_v28, %v2404_v27  ;;  %v2858_v27 = vunpack.c.l.b16 %v2819_v16 }
 0x281   :  { %v2680_v35 = vadd.f32 %v2679_v34, %v2405_v32  ;;  %v2860_v32 = vunpack.c.l.b16 %v2821_v23 }
 0x283   :  { %v2681_v37 = vadd.f32 %v2680_v35, %v2406_v53  ;;  %v4038_v53 = vld [vmem:[#allocation8] sm:$0xff]  }
 0x285   :  { %v2682_v24 = vadd.f32 %v2681_v37, %v2407_v36  ;;  %v4040_v36 = vld [vmem:[#allocation8 + $0x10] sm:$0xff]   ;;  %v4042_v37 = vld [vmem:[#allocation8 + $0x20] sm:$0xff]  }
 0x287   :  { %v2683_v44 = vadd.f32 %v2682_v24, %v2408_v38  ;;  %v4044_v38 = vld [vmem:[#allocation8 + $0x30] sm:$0xff]  }
 0x289   :  { %v2684_v50 = vadd.f32 %v2683_v44, %v2409_v43 }
 0x28b   :  { %v2685_v54 = vadd.f32 %v2684_v50, %v2410_v49  ;;  %v4048_v50 = vld [vmem:[#allocation10 + $0x10] sm:$0xff]  }
 0x28d   :  { %v2686_v58 = vadd.f32 %v2685_v54, %v2411_v52  ;;  %v4051_v52 = vld [vmem:[#allocation10 + $0x28] sm:$0xff]   ;;  %v4052_v54 = vld [vmem:[#allocation10 + $0x30] sm:$0xff]  }
 0x28f   :  { %v2687_v62 = vadd.f32 %v2686_v58, %v2412_v56  ;;  %v3355_v56 = vld [vmem:[%s4735_s6] ss:$0 sm:$0xff]  ;;  %s4166_s6 = scalar_lea.vmem %s3199_s14, 128 }
 0x290   :  { %p4167_p12 = scmp.ne.s32.totalorder %s3199_s14, %s4166_s6  ;;  %p4172_p0 = scmp.lt.s32.totalorder %s4166_s6, %s4166_s6 }
 0x291   :  { %v2688_v3 = vadd.f32 %v2687_v62, %v2413_v47 }
 0x292   :  { %p4173_p1 = por %p4172_p0, %p4171_p13 }
 0x293   :  { %v2689_v25 = vrot.slane %v2688_v3, 4 }
 0x294   :  { %p4174_p2 = pnand %p4173_p1, %p4167_p12 }
 0x295   :  { %v2690_v45 = vadd.f32 %v2689_v25, %v2688_v3  ;;  %v3364_v3 = vld [vmem:[%s4737_s8] ss:$0 sm:$0xff] }
 0x297   :  { %v2691_v7 = vrot.slane %v2690_v45, 2 }
 0x299   :  { %v2692_v8 = vadd.f32 %v2691_v7, %v2690_v45 }
 0x29b   :  { %v2693_v10 = vrot.slane %v2692_v8, 1 }
 0x29d   :  { %v2694_v13 = vadd.f32 %v2693_v10, %v2692_v8 }
 0x29f   :  { %v2810_v15 = vmul.f32 0.00390625, %v2694_v13 }
 0x2a1   :  { %v2818_v20 = vpack.c.bf16 %v2810_v15, %v2810_v15 }
 0x2a3   :  { %v2857_v26 = vunpack.c.l.b16 %v2818_v20 }
 0x2a5   :  { %v2868_v28 = vsel %vm2867_vm4, %v2857_v26, %v4648_v31  ;;  %v4041_v31 = vld [vmem:[#allocation8 + $0x18] sm:$0xff]  }
 0x2a6   :  { %v2870_v2 = vsel %vm2869_vm5, %v2858_v27, %v2868_v28 }
 0x2a7   :  { %v2872_v34 = vsel %vm2871_vm6, %v2859_v61, %v2870_v2 }
 0x2a8   :  { %v2874_v57 = vsel %vm2873_vm7, %v2860_v32, %v2872_v34 }
 0x2a9   :  { %v2875_v35 = vpack.c.b16 %v2874_v57, %v2874_v57 }
 0x2ab   :  { %3825 = vmatmul.mubr.bf16.vlgmr.msra.gmra.mrb[108].mxu1 %v2875_v35 }
 0x2ac   :  { %3829 = vmatpush3.bf16.msra.mxu1 %v4038_v53  ;;  %3844 = vmatprep.mubr.msk.bf16.mxu1 %vm4204_vm1, %v4203_v59 }
 0x2ad   :  { %3830 = vmatprep.subr.bf16.mxu1 %v4203_v59 }
 0x2b0   :  { %3831 = vmatpush3.bf16.msra.mxu1 %v4039_v63 }
 0x2b1   :  { %3832 = vmatprep.subr.bf16.mxu1 %v4203_v59 }
 0x2b4   :  { %3833 = vmatpush3.bf16.msra.mxu1 %v4040_v36 }
 0x2b5   :  { %3834 = vmatprep.subr.bf16.mxu1 %v4203_v59 }
 0x2b8   :  { %3835 = vmatpush3.bf16.msra.mxu1 %v4041_v31 }
 0x2b9   :  { %3836 = vmatprep.subr.bf16.mxu1 %v4203_v59 }
 0x2bc   :  { %3837 = vmatpush3.bf16.msra.mxu1 %v4042_v37 }
 0x2bd   :  { %3838 = vmatprep.subr.bf16.mxu1 %v4203_v59 }
 0x2c0   :  { %3839 = vmatpush3.bf16.msra.mxu1 %v4043_v29 }
 0x2c1   :  { %3840 = vmatprep.subr.bf16.mxu1 %v4203_v59 }
 0x2c4   :  { %3841 = vmatpush3.bf16.msra.mxu1 %v4044_v38 }
 0x2c5   :  { %3842 = vmatprep.subr.bf16.mxu1 %v4203_v59 }
 0x2c8   :  { %3843 = vmatpush3.bf16.msra.mxu1 %v4045_v17 }
 0x2c9   :  { %3848 = vmatprep.subr.bf16.mxu1 %v4203_v59 }
 0x37e   :  { %v2959_v24 = vpop.f32.mrb[108].mxu1 }
 0x37f   :  { %v2960_v42 = vadd.f32 %v3346_v40, %v2959_v24  ;;  %v3826_v43 = vpop.f32.mrb[109].mxu1 }
 0x380   :  { %v2962_v11 = vpop.f32.mrb[110].mxu1 }
 0x381   :  { %v2965_v44 = vmax.f32 %v2960_v42, 0.0  ;;  %v3827_v19 = vpop.f32.mrb[111].mxu1 }
 0x383   :  { %v2966_v49 = vpack.c.bf16 %v2965_v44, %v2965_v44 }
 0x385   :  { %3845 = vmatmul.mubr.bf16.vlgmr.msra.gmra.mrb[112].mxu1 %v2966_v49 }
 0x386   :  { %3849 = vmatpush3.bf16.msra.mxu1 %v4046_v48  ;;  %3864 = vmatprep.mubr.msk.bf16.mxu1 %vm4204_vm1, %v4203_v59 }
 0x387   :  { %3850 = vmatprep.subr.bf16.mxu1 %v4203_v59 }
 0x38a   :  { %3851 = vmatpush3.bf16.msra.mxu1 %v4047_v21 }
 0x38b   :  { %3852 = vmatprep.subr.bf16.mxu1 %v4203_v59 }
 0x38e   :  { %3853 = vmatpush3.bf16.msra.mxu1 %v4048_v50 }
 0x38f   :  { %3854 = vmatprep.subr.bf16.mxu1 %v4203_v59 }
 0x392   :  { %3855 = vmatpush3.bf16.msra.mxu1 %v4049_v39 }
 0x393   :  { %3856 = vmatprep.subr.bf16.mxu1 %v4203_v59 }
 0x396   :  { %3857 = vmatpush3.bf16.msra.mxu1 %v4050_v51 }
 0x397   :  { %3858 = vmatprep.subr.bf16.mxu1 %v4203_v59 }
 0x39a   :  { %3859 = vmatpush3.bf16.msra.mxu1 %v4051_v52 }
 0x39b   :  { %3860 = vmatprep.subr.bf16.mxu1 %v4203_v59 }
 0x39e   :  { %3861 = vmatpush3.bf16.msra.mxu1 %v4052_v54 }
 0x39f   :  { %3862 = vmatprep.subr.bf16.mxu1 %v4203_v59 }
 0x3a2   :  { %3863 = vmatpush3.bf16.msra.mxu1 %v4053_v55 }
 0x458   :  { %v3072_v46 = vpop.f32.mrb[112].mxu1 }
 0x459   :  { %v3073_v58 = vadd.f32 %v3355_v56, %v3072_v46  ;;  %v3846_v60 = vpop.f32.mrb[113].mxu1 }
 0x45a   :  { %v3075_v47 = vpop.f32.mrb[114].mxu1 }
 0x45b   :  { %v3078_v62 = vmax.f32 %v3073_v58, 0.0  ;;  %v3847_v1 = vpop.f32.mrb[115].mxu1 }
 0x45d   :  { %v3079_v33 = vpack.c.bf16 %v3078_v62, %v3078_v62 }
 0x45f   :  { %3865 = vmatmul.mubr.bf16.vlgmr.msra.gmra.mrb[116].mxu1 %v3079_v33 }
 0x532   :  { %v3185_v59 = vpop.f32.mrb[116].mxu1 }
 0x533   :  { %v3186_v30 = vadd.f32 %v3364_v3, %v3185_v59  ;;  %v3866_v25 = vpop.f32.mrb[117].mxu1 }
 0x534   :  { %v3188_v4 = vpop.f32.mrb[118].mxu1 }
 0x535   :  { %3191 = vst [vmem:[#allocation11] sm:$0xff] %v3186_v30  ;;  %v3867_v5 = vpop.f32.mrb[119].mxu1 }
 0x536   :  { %4177 = shalt.err (!%p4174_p2)
}
 0x537   :  { %s4178_s8 = scalar_lea.hbm %s4738_s9, 128 }
 0x538   :  { %p4179_p3 = scmp.ne.s32.totalorder %s4738_s9, %s4178_s8  ;;  %p4182_p4 = scmp.lt.u32.totalorder %s4178_s8, %s4738_s9 }
 0x53a   :  { %p4184_p5 = pnand %p4182_p4, %p4179_p3 }
 0x53c   :  { %4187 = shalt.err (!%p4184_p5)
}
 0x53d   :  { %3201 = dma.vmem_to_hbm [thread:$0]  %s3199_s14, 128, %s4738_s9, [#allocation4]  }
 0x53e   :  { %4194 = dma.done.wait [#allocation4], 128  }
 0x53f   :  { %4195 = vsyncadd [#allocation4], 4294967168 }
 0x540   :  { %3205 = vsyncpa [#allocation3], 1 }
 0x541   :  { %3206 = vsyncpa [#allocation6], 1 }
 0x542   :  { %3207 = vsyncpa [#allocation9], 1 }
 0x543   :  { %3208 = vsyncpa [#allocation4], 1 }

</bundles_post_ra>
